<compile_context>
chip_gen: v7x
topology: tpu7x:2x2x1
jax: 0.10.0
libtpu: 0.0.40
codegen_flags: <defaults>
</compile_context>

<pallas_src>
import jax
import jax.numpy as jnp
from jax.experimental import pallas as pl
from jax.experimental.pallas import tpu as pltpu


# ----------------------------- in-kernel math helpers -----------------------------

def _erf_poly(x):
    # Abramowitz & Stegun 7.1.26 rational approximation (|err| < 1.5e-7, ~f32 eps).
    p = 0.3275911
    a1, a2, a3, a4, a5 = 0.254829592, -0.284496736, 1.421413741, -1.453152027, 1.061405429
    s = jnp.where(x < 0.0, -1.0, 1.0)
    ax = jnp.abs(x)
    t = 1.0 / (1.0 + p * ax)
    poly = ((((a5 * t + a4) * t + a3) * t + a2) * t + a1) * t
    return s * (1.0 - poly * jnp.exp(-ax * ax))


def _gelu(x):
    # exact (erf-based) GELU, matching torch.nn.GELU() default (approximate='none')
    return 0.5 * x * (1.0 + _erf_poly(x * 0.7071067811865476))


def _sigmoid(x):
    # 0.5*(tanh(x/2)+1): single EUP op, no divide, numerically stable for large |x|
    return 0.5 * (jnp.tanh(0.5 * x) + 1.0)


def _layernorm(x, g, b, eps=1e-5):
    mu = jnp.mean(x, axis=-1, keepdims=True)
    xc = x - mu
    var = jnp.mean(xc * xc, axis=-1, keepdims=True)
    return xc * jax.lax.rsqrt(var + eps) * g + b


# ----------------------------------- kernel ---------------------------------------

def _make_kernel(L, E, H, M, O, NL, G, GW, RIN, PER):
    # misc-slab row offsets (static)
    R_INP1 = 0                 # W_inp1^T : (M, E)
    R_ORNN = M                 # out_W0^T rnn part : (H, M)
    R_OUT1 = M + H             # W_out1^T : (M, O)
    R_B = M + H + M            # 8 bias/LN rows

    def kernel(cat_ref, h0_ref, wfront_ref, gruw_ref, misc_ref, out_ref):
        # ---- fused "front" matmul: mlp_inp.lin0  +  dec part of mlp_out.lin0 ----
        front = jnp.dot(cat_ref[...], wfront_ref[...],
                        preferred_element_type=jnp.float32)            # (L, 2*GW)
        x = front[:, :M] + misc_ref[R_B + 0:R_B + 1, :M]               # mlp_inp lin0
        y_dec = front[:, GW:GW + M]                                    # dec @ out_W0_dec^T

        # ---- rest of mlp_inp: GELU -> LayerNorm -> Linear -> GELU ----
        x = _gelu(x)
        x = _layernorm(x, misc_ref[R_B + 1:R_B + 2, :M], misc_ref[R_B + 2:R_B + 3, :M])
        x = jnp.dot(x, misc_ref[R_INP1:R_INP1 + M, :E],
                    preferred_element_type=jnp.float32) + misc_ref[R_B + 3:R_B + 4, :E]
        layer_in = _gelu(x)                                            # (L, E): GRU layer-0 input

        # ---- layer-major multi-layer GRU, gates lane-aligned at 0 / G / 2G ----
        for l in range(NL):                                            # static unroll over layers
            base = l * PER
            e_in = E if l == 0 else H
            wih = gruw_ref[base:base + e_in, :]                        # (e_in, 3G) fused gates
            whh = gruw_ref[base + RIN:base + RIN + H, :]               # (H,    3G) fused gates
            b_comb = gruw_ref[base + RIN + H:base + RIN + H + 1, :]    # (1, 3G): b_ih (+ b_hh on r/z)
            bhh_n = gruw_ref[base + RIN + H + 1:base + RIN + H + 2, :H]  # (1, H): n-gate b_hh

            # whole-sequence input projection, hoisted out of the time loop
            gi_all = jnp.dot(layer_in, wih,
                             preferred_element_type=jnp.float32) + b_comb  # (L, 3G)
            gi_rz = [gi_all[t:t + 1, :2 * G] for t in range(L)]        # hoisted per-step slices
            gi_n = [gi_all[t:t + 1, 2 * G:2 * G + H] for t in range(L)]

            h = h0_ref[l:l + 1, :]                                     # (1, H), carried in vregs
            hs = []
            for t in range(L):                                         # fully unrolled (static L)
                gh = jnp.dot(h, whh, preferred_element_type=jnp.float32)   # (1, 3G)
                rz = _sigmoid(gi_rz[t] + gh[:, :2 * G])                # fused r/z: ONE EUP op
                r = rz[:, :H]                                          # lane 0 start, no rotate
                z = rz[:, G:G + H]                                     # vreg-boundary start
                n = jnp.tanh(gi_n[t] + r * (gh[:, 2 * G:2 * G + H] + bhh_n))
                h = (1.0 - z) * n + z * h
                hs.append(h)                                           # stays in vregs
            layer_in = jnp.concatenate(hs, axis=0)                     # (L, H): layer output seq

        rnn_out = layer_in                                             # (L, H): top-layer outputs

        # ---- mlp_out: Linear -> GELU -> LayerNorm -> Linear -> Sigmoid ----
        y = y_dec + jnp.dot(rnn_out, misc_ref[R_ORNN:R_ORNN + H, :M],
                            preferred_element_type=jnp.float32) + misc_ref[R_B + 4:R_B + 5, :M]
        y = _gelu(y)
        y = _layernorm(y, misc_ref[R_B + 5:R_B + 6, :M], misc_ref[R_B + 6:R_B + 7, :M])
        y = jnp.dot(y, misc_ref[R_OUT1:R_OUT1 + M, :O],
                    preferred_element_type=jnp.float32) + misc_ref[R_B + 7:R_B + 8, :O]
        out_ref[...] = _sigmoid(y)

    return kernel


# ----------------------------------- wrapper ---------------------------------------

def policy_rnn_forward(dec, xs, prob, hidden, p):
    L, E = dec.shape
    NL, H = hidden.shape
    M = H                                    # GRU hidden size == mid_dim
    assert p["inp_W0"].shape[0] == M
    O = p["out_W1"].shape[0]
    f32 = jnp.float32

    G = 128                                  # lane-aligned gate block width (r/z/n at 0/G/2G)
    GW = 128                                 # lane block width for the fused front matmul
    RIN = max(E, H)                          # row count of the packed W_ih^T block
    PER = ((RIN + H + 2 + 7) // 8) * 8       # per-layer slab rows, sublane-aligned
    KIN = ((E + 2 + 7) // 8) * 8             # front contraction dim padded to a sublane multiple

    def pad_gate_cols(w3h):                  # (rows, 3H) -> (rows, 3G), gates at lanes 0/G/2G
        out = jnp.zeros((w3h.shape[0], 3 * G), f32)
        out = out.at[:, 0:H].set(w3h[:, 0:H])
        out = out.at[:, G:G + H].set(w3h[:, H:2 * H])
        out = out.at[:, 2 * G:2 * G + H].set(w3h[:, 2 * H:3 * H])
        return out

    # fused front weight: lanes [0:M) = inp_W0^T, lanes [GW:GW+M) = dec rows of out_W0^T
    W0T = p["inp_W0"].T.astype(f32)          # (E+2, M)
    Wo0T = p["out_W0"].T.astype(f32)         # (E+H, M)
    w_front = jnp.zeros((KIN, 2 * GW), f32)
    w_front = w_front.at[:E + 2, :M].set(W0T)
    w_front = w_front.at[:E, GW:GW + M].set(Wo0T[:E])

    # misc slab: three small weights + all 8 bias/LN rows on one 128-lane slab
    misc = jnp.zeros((2 * M + H + 8, GW), f32)
    misc = misc.at[0:M, :E].set(p["inp_W1"].T.astype(f32))             # R_INP1
    misc = misc.at[M:M + H, :M].set(Wo0T[E:])                          # R_ORNN
    misc = misc.at[M + H:M + H + M, :O].set(p["out_W1"].T.astype(f32))  # R_OUT1
    R_B = M + H + M
    for i, (vec, w) in enumerate([(p["inp_b0"], M), (p["inp_ln_g"], M), (p["inp_ln_b"], M),
                                  (p["inp_b1"], E), (p["out_b0"], M), (p["out_ln_g"], M),
                                  (p["out_ln_b"], M), (p["out_b1"], O)]):
        misc = misc.at[R_B + i, :w].set(vec.astype(f32))

    # GRU slab: per layer [W_ih^T ; W_hh^T ; b_comb ; b_hh_n] with gate-lane-aligned columns
    blocks = []
    for l in range(NL):
        g = p["gru"][l]
        e_in = E if l == 0 else H
        wih = jnp.zeros((RIN, 3 * G), f32).at[:e_in, :].set(pad_gate_cols(g["W_ih"].T.astype(f32)))
        whh = pad_gate_cols(g["W_hh"].T.astype(f32))                   # (H, 3G)
        b_ih = g["b_ih"].astype(f32)
        b_hh = g["b_hh"].astype(f32)
        b_comb_3h = jnp.concatenate([b_ih[:2 * H] + b_hh[:2 * H], b_ih[2 * H:]])
        b_comb = pad_gate_cols(b_comb_3h[None, :])                     # (1, 3G)
        bhh_n = jnp.zeros((1, 3 * G), f32).at[0, :H].set(b_hh[2 * H:])  # (1, 3G), data in lanes [0:H)
        blk = jnp.concatenate([wih, whh, b_comb, bhh_n], axis=0)       # (RIN+H+2, 3G)
        blk = jnp.pad(blk, ((0, PER - blk.shape[0]), (0, 0)))          # sublane-align slab stride
        blocks.append(blk)
    gru_pack = jnp.concatenate(blocks, axis=0)                         # (NL*PER, 3G)

    # runtime inputs: concat(dec, xs, prob) once at the JAX level, zero-pad contraction dim
    cat_in = jnp.concatenate([dec, xs, prob], axis=1).astype(f32)      # (L, E+2)
    cat_in = jnp.pad(cat_in, ((0, 0), (0, KIN - cat_in.shape[1])))     # (L, KIN)

    inputs = [cat_in, hidden.astype(f32), w_front, gru_pack, misc]     # 5 packed inputs

    vmem = pltpu.MemorySpace.VMEM
    return pl.pallas_call(
        _make_kernel(L, E, H, M, O, NL, G, GW, RIN, PER),
        out_shape=jax.ShapeDtypeStruct((L, O), jnp.float32),
        in_specs=[pl.BlockSpec(memory_space=vmem)] * len(inputs),
        out_specs=pl.BlockSpec(memory_space=vmem),
    )(*inputs)


# ----------------------------- deterministic parameters -----------------------------

def init_params(key, E, M, O, NL):
    # Deterministic synthetic init with PyTorch-equivalent shapes (W: (out, in)).
    # TODO(synk): orthogonal init is not reproduced exactly; only shapes/semantics matter here.
    H = M
    ks = list(jax.random.split(key, 32))
    it = iter(ks)

    def w(shape, scale=0.2):
        return jax.random.normal(next(it), shape, jnp.float32) * scale

    p = {}
    p["inp_W0"] = w((M, E + 2))
    p["inp_b0"] = w((M,), 0.05)
    p["inp_ln_g"] = jnp.ones((M,), jnp.float32)
    p["inp_ln_b"] = jnp.zeros((M,), jnp.float32)
    p["inp_W1"] = w((E, M), 0.1)
    p["inp_b1"] = jnp.full((E,), 1e-6, jnp.float32)
    p["gru"] = []
    for l in range(NL):
        in_l = E if l == 0 else H
        p["gru"].append(dict(W_ih=w((3 * H, in_l)), W_hh=w((3 * H, H)),
                             b_ih=w((3 * H,), 0.05), b_hh=w((3 * H,), 0.05)))
    p["out_W0"] = w((M, E + H))
    p["out_b0"] = w((M,), 0.05)
    p["out_ln_g"] = jnp.ones((M,), jnp.float32)
    p["out_ln_b"] = jnp.zeros((M,), jnp.float32)
    p["out_W1"] = w((O, M), 0.1)
    p["out_b1"] = jnp.full((O,), 1e-6, jnp.float32)
    return p


# ----------------------------- pure-JAX reference (PyTorch mirror) ------------------

def _ref_forward(dec, xs, prob, hidden, p):
    hi = jax.lax.Precision.HIGHEST
    gelu = lambda x: 0.5 * x * (1.0 + jax.lax.erf(x / jnp.float32(jnp.sqrt(2.0))))
    sig = jax.nn.sigmoid

    def ln(x, g, b):
        mu = x.mean(-1, keepdims=True)
        xc = x - mu
        var = (xc * xc).mean(-1, keepdims=True)
        return xc / jnp.sqrt(var + 1e-5) * g + b

    x = jnp.concatenate([dec, xs, prob], axis=1)
    x = jnp.dot(x, p["inp_W0"].T, precision=hi) + p["inp_b0"]
    x = ln(gelu(x), p["inp_ln_g"], p["inp_ln_b"])
    x = gelu(jnp.dot(x, p["inp_W1"].T, precision=hi) + p["inp_b1"])

    NL = len(p["gru"])
    H = p["inp_W0"].shape[0]
    h = [hidden[l] for l in range(NL)]
    outs = []
    for t in range(x.shape[0]):
        xt = x[t]
        for l in range(NL):
            g = p["gru"][l]
            gi = jnp.dot(g["W_ih"], xt, precision=hi) + g["b_ih"]
            gh = jnp.dot(g["W_hh"], h[l], precision=hi) + g["b_hh"]
            r = sig(gi[:H] + gh[:H])
            z = sig(gi[H:2 * H] + gh[H:2 * H])
            n = jnp.tanh(gi[2 * H:] + r * gh[2 * H:])
            h[l] = (1.0 - z) * n + z * h[l]
            xt = h[l]
        outs.append(xt)
    rnn_out = jnp.stack(outs, axis=0)

    y = jnp.concatenate([dec, rnn_out], axis=1)
    y = jnp.dot(y, p["out_W0"].T, precision=hi) + p["out_b0"]
    y = ln(gelu(y), p["out_ln_g"], p["out_ln_b"])
    y = jnp.dot(y, p["out_W1"].T, precision=hi) + p["out_b1"]
    return sig(y)


# -------------------------------------- main ---------------------------------------

if __name__ == "__main__":
    E, M, O, NL = 16, 32, 8, 2   # embed_dim, mid_dim, out_dim, num_layers
    L = 8                        # dim0 of the 2-D inputs == GRU time axis

    key = jax.random.PRNGKey(0)
    kp, kd, kx, kpr, kh = jax.random.split(key, 5)
    params = init_params(kp, E, M, O, NL)

    dec_node_i = jax.random.normal(kd, (L, E), jnp.float32)
    xs_flt_i = jax.random.normal(kx, (L, 1), jnp.float32)
    prob = jax.nn.sigmoid(jax.random.normal(kpr, (L, 1), jnp.float32))
    hidden = jax.random.normal(kh, (NL, M), jnp.float32) * 0.1

    out = policy_rnn_forward(dec_node_i, xs_flt_i, prob, hidden, params)
    out = jax.block_until_ready(out)

    ref = _ref_forward(dec_node_i, xs_flt_i, prob, hidden, params)
    assert out.shape == (L, O), out.shape
    max_err = float(jnp.max(jnp.abs(out - ref)))
    assert jnp.allclose(out, ref, atol=1e-3, rtol=1e-3), max_err
    print("KERNEL_OK")
</pallas_src>

<mosaic_0001>
module attributes {stable_mosaic.version = 11 : i64} {
  func.func @kernel(%arg0: memref<8x24xf32, #tpu.memory_space<vmem>>, %arg1: memref<2x32xf32, #tpu.memory_space<vmem>>, %arg2: memref<24x256xf32, #tpu.memory_space<vmem>>, %arg3: memref<144x384xf32, #tpu.memory_space<vmem>>, %arg4: memref<104x128xf32, #tpu.memory_space<vmem>>, %arg5: memref<8x8xf32, #tpu.memory_space<vmem>>) attributes {dimension_semantics = [], scalar_prefetch = 0 : i64, scratch_operands = 0 : i64, tpu.core_type = #tpu.core_type<tc>} {
    %c0 = arith.constant 0 : index
    %c0_0 = arith.constant 0 : index
    %0 = vector.load %arg0[%c0, %c0_0] : memref<8x24xf32, #tpu.memory_space<vmem>>, vector<8x24xf32>
    %c0_1 = arith.constant 0 : index
    %c0_2 = arith.constant 0 : index
    %1 = vector.load %arg2[%c0_1, %c0_2] : memref<24x256xf32, #tpu.memory_space<vmem>>, vector<24x256xf32>
    %cst = arith.constant dense<0.000000e+00> : vector<8x256xf32>
    %2 = tpu.matmul %0, %1, %cst {dimension_numbers = #tpu.dot_dimension_numbers<[1], [0], [0], [1], [0, 0, 1, 1], [], []>} : vector<8x24xf32>, vector<24x256xf32>, vector<8x256xf32> -> vector<8x256xf32>
    %3 = vector.extract_strided_slice %2 {offsets = [0, 0], sizes = [8, 32], strides = [1, 1]} : vector<8x256xf32> to vector<8x32xf32>
    %c96 = arith.constant 96 : index
    %c0_3 = arith.constant 0 : index
    %4 = vector.load %arg4[%c96, %c0_3] : memref<104x128xf32, #tpu.memory_space<vmem>>, vector<1x32xf32>
    %5 = vector.broadcast %4 : vector<1x32xf32> to vector<8x32xf32>
    %6 = arith.addf %3, %5 : vector<8x32xf32>
    %7 = vector.extract_strided_slice %2 {offsets = [0, 128], sizes = [8, 32], strides = [1, 1]} : vector<8x256xf32> to vector<8x32xf32>
    %cst_4 = arith.constant 5.000000e-01 : f32
    %8 = vector.broadcast %cst_4 : f32 to vector<8x32xf32>
    %9 = arith.mulf %8, %6 : vector<8x32xf32>
    %cst_5 = arith.constant 0.707106769 : f32
    %10 = vector.broadcast %cst_5 : f32 to vector<8x32xf32>
    %11 = arith.mulf %6, %10 : vector<8x32xf32>
    %cst_6 = arith.constant 0.000000e+00 : f32
    %12 = vector.broadcast %cst_6 : f32 to vector<8x32xf32>
    %13 = arith.cmpf olt, %11, %12 : vector<8x32xf32>
    %cst_7 = arith.constant -1.000000e+00 : f32
    %cst_8 = arith.constant 1.000000e+00 : f32
    %14 = vector.broadcast %cst_7 : f32 to vector<8x32xf32>
    %15 = vector.broadcast %cst_8 : f32 to vector<8x32xf32>
    %16 = arith.select %13, %14, %15 : vector<8x32xi1>, vector<8x32xf32>
    %17 = math.absf %11 : vector<8x32xf32>
    %cst_9 = arith.constant 0.327591091 : f32
    %18 = vector.broadcast %cst_9 : f32 to vector<8x32xf32>
    %19 = arith.mulf %18, %17 : vector<8x32xf32>
    %cst_10 = arith.constant 1.000000e+00 : f32
    %20 = vector.broadcast %cst_10 : f32 to vector<8x32xf32>
    %21 = arith.addf %20, %19 : vector<8x32xf32>
    %cst_11 = arith.constant 1.000000e+00 : f32
    %22 = vector.broadcast %cst_11 : f32 to vector<8x32xf32>
    %23 = arith.divf %22, %21 : vector<8x32xf32>
    %cst_12 = arith.constant 1.06140542 : f32
    %24 = vector.broadcast %cst_12 : f32 to vector<8x32xf32>
    %25 = arith.mulf %24, %23 : vector<8x32xf32>
    %cst_13 = arith.constant -1.45315206 : f32
    %26 = vector.broadcast %cst_13 : f32 to vector<8x32xf32>
    %27 = arith.addf %25, %26 : vector<8x32xf32>
    %28 = arith.mulf %27, %23 : vector<8x32xf32>
    %cst_14 = arith.constant 1.42141378 : f32
    %29 = vector.broadcast %cst_14 : f32 to vector<8x32xf32>
    %30 = arith.addf %28, %29 : vector<8x32xf32>
    %31 = arith.mulf %30, %23 : vector<8x32xf32>
    %cst_15 = arith.constant -0.284496725 : f32
    %32 = vector.broadcast %cst_15 : f32 to vector<8x32xf32>
    %33 = arith.addf %31, %32 : vector<8x32xf32>
    %34 = arith.mulf %33, %23 : vector<8x32xf32>
    %cst_16 = arith.constant 0.254829586 : f32
    %35 = vector.broadcast %cst_16 : f32 to vector<8x32xf32>
    %36 = arith.addf %34, %35 : vector<8x32xf32>
    %37 = arith.mulf %36, %23 : vector<8x32xf32>
    %cst_17 = arith.constant 0.000000e+00 : f32
    %38 = vector.broadcast %cst_17 : f32 to vector<8x32xf32>
    %39 = arith.subf %38, %17 : vector<8x32xf32>
    %40 = arith.mulf %39, %17 : vector<8x32xf32>
    %41 = math.exp %40 : vector<8x32xf32>
    %42 = arith.mulf %37, %41 : vector<8x32xf32>
    %cst_18 = arith.constant 1.000000e+00 : f32
    %43 = vector.broadcast %cst_18 : f32 to vector<8x32xf32>
    %44 = arith.subf %43, %42 : vector<8x32xf32>
    %45 = arith.mulf %16, %44 : vector<8x32xf32>
    %cst_19 = arith.constant 1.000000e+00 : f32
    %46 = vector.broadcast %cst_19 : f32 to vector<8x32xf32>
    %47 = arith.addf %46, %45 : vector<8x32xf32>
    %48 = arith.mulf %9, %47 : vector<8x32xf32>
    %c97 = arith.constant 97 : index
    %c0_20 = arith.constant 0 : index
    %49 = vector.load %arg4[%c97, %c0_20] : memref<104x128xf32, #tpu.memory_space<vmem>>, vector<1x32xf32>
    %c98 = arith.constant 98 : index
    %c0_21 = arith.constant 0 : index
    %50 = vector.load %arg4[%c98, %c0_21] : memref<104x128xf32, #tpu.memory_space<vmem>>, vector<1x32xf32>
    %cst_22 = arith.constant dense<0.000000e+00> : vector<8xf32>
    %51 = vector.multi_reduction <add>, %48, %cst_22 [1] : vector<8x32xf32> to vector<8xf32>
    %52 = vector.shape_cast %51 : vector<8xf32> to vector<8x1xf32>
    %cst_23 = arith.constant 3.200000e+01 : f32
    %53 = vector.broadcast %cst_23 : f32 to vector<8x1xf32>
    %54 = arith.divf %52, %53 : vector<8x1xf32>
    %55 = vector.broadcast %54 : vector<8x1xf32> to vector<8x32xf32>
    %56 = arith.subf %48, %55 : vector<8x32xf32>
    %57 = arith.mulf %56, %56 : vector<8x32xf32>
    %cst_24 = arith.constant dense<0.000000e+00> : vector<8xf32>
    %58 = vector.multi_reduction <add>, %57, %cst_24 [1] : vector<8x32xf32> to vector<8xf32>
    %59 = vector.shape_cast %58 : vector<8xf32> to vector<8x1xf32>
    %cst_25 = arith.constant 3.200000e+01 : f32
    %60 = vector.broadcast %cst_25 : f32 to vector<8x1xf32>
    %61 = arith.divf %59, %60 : vector<8x1xf32>
    %cst_26 = arith.constant 9.99999974E-6 : f32
    %62 = vector.broadcast %cst_26 : f32 to vector<8x1xf32>
    %63 = arith.addf %61, %62 : vector<8x1xf32>
    %64 = math.rsqrt %63 : vector<8x1xf32>
    %65 = vector.broadcast %64 : vector<8x1xf32> to vector<8x32xf32>
    %66 = arith.mulf %56, %65 : vector<8x32xf32>
    %67 = vector.broadcast %49 : vector<1x32xf32> to vector<8x32xf32>
    %68 = arith.mulf %66, %67 : vector<8x32xf32>
    %69 = vector.broadcast %50 : vector<1x32xf32> to vector<8x32xf32>
    %70 = arith.addf %68, %69 : vector<8x32xf32>
    %c0_27 = arith.constant 0 : index
    %c0_28 = arith.constant 0 : index
    %71 = vector.load %arg4[%c0_27, %c0_28] : memref<104x128xf32, #tpu.memory_space<vmem>>, vector<32x16xf32>
    %cst_29 = arith.constant dense<0.000000e+00> : vector<8x16xf32>
    %72 = tpu.matmul %70, %71, %cst_29 {dimension_numbers = #tpu.dot_dimension_numbers<[1], [0], [0], [1], [0, 0, 1, 1], [], []>} : vector<8x32xf32>, vector<32x16xf32>, vector<8x16xf32> -> vector<8x16xf32>
    %c99 = arith.constant 99 : index
    %c0_30 = arith.constant 0 : index
    %73 = vector.load %arg4[%c99, %c0_30] : memref<104x128xf32, #tpu.memory_space<vmem>>, vector<1x16xf32>
    %74 = vector.broadcast %73 : vector<1x16xf32> to vector<8x16xf32>
    %75 = arith.addf %72, %74 : vector<8x16xf32>
    %cst_31 = arith.constant 5.000000e-01 : f32
    %76 = vector.broadcast %cst_31 : f32 to vector<8x16xf32>
    %77 = arith.mulf %76, %75 : vector<8x16xf32>
    %cst_32 = arith.constant 0.707106769 : f32
    %78 = vector.broadcast %cst_32 : f32 to vector<8x16xf32>
    %79 = arith.mulf %75, %78 : vector<8x16xf32>
    %cst_33 = arith.constant 0.000000e+00 : f32
    %80 = vector.broadcast %cst_33 : f32 to vector<8x16xf32>
    %81 = arith.cmpf olt, %79, %80 : vector<8x16xf32>
    %cst_34 = arith.constant -1.000000e+00 : f32
    %cst_35 = arith.constant 1.000000e+00 : f32
    %82 = vector.broadcast %cst_34 : f32 to vector<8x16xf32>
    %83 = vector.broadcast %cst_35 : f32 to vector<8x16xf32>
    %84 = arith.select %81, %82, %83 : vector<8x16xi1>, vector<8x16xf32>
    %85 = math.absf %79 : vector<8x16xf32>
    %cst_36 = arith.constant 0.327591091 : f32
    %86 = vector.broadcast %cst_36 : f32 to vector<8x16xf32>
    %87 = arith.mulf %86, %85 : vector<8x16xf32>
    %cst_37 = arith.constant 1.000000e+00 : f32
    %88 = vector.broadcast %cst_37 : f32 to vector<8x16xf32>
    %89 = arith.addf %88, %87 : vector<8x16xf32>
    %cst_38 = arith.constant 1.000000e+00 : f32
    %90 = vector.broadcast %cst_38 : f32 to vector<8x16xf32>
    %91 = arith.divf %90, %89 : vector<8x16xf32>
    %cst_39 = arith.constant 1.06140542 : f32
    %92 = vector.broadcast %cst_39 : f32 to vector<8x16xf32>
    %93 = arith.mulf %92, %91 : vector<8x16xf32>
    %cst_40 = arith.constant -1.45315206 : f32
    %94 = vector.broadcast %cst_40 : f32 to vector<8x16xf32>
    %95 = arith.addf %93, %94 : vector<8x16xf32>
    %96 = arith.mulf %95, %91 : vector<8x16xf32>
    %cst_41 = arith.constant 1.42141378 : f32
    %97 = vector.broadcast %cst_41 : f32 to vector<8x16xf32>
    %98 = arith.addf %96, %97 : vector<8x16xf32>
    %99 = arith.mulf %98, %91 : vector<8x16xf32>
    %cst_42 = arith.constant -0.284496725 : f32
    %100 = vector.broadcast %cst_42 : f32 to vector<8x16xf32>
    %101 = arith.addf %99, %100 : vector<8x16xf32>
    %102 = arith.mulf %101, %91 : vector<8x16xf32>
    %cst_43 = arith.constant 0.254829586 : f32
    %103 = vector.broadcast %cst_43 : f32 to vector<8x16xf32>
    %104 = arith.addf %102, %103 : vector<8x16xf32>
    %105 = arith.mulf %104, %91 : vector<8x16xf32>
    %cst_44 = arith.constant 0.000000e+00 : f32
    %106 = vector.broadcast %cst_44 : f32 to vector<8x16xf32>
    %107 = arith.subf %106, %85 : vector<8x16xf32>
    %108 = arith.mulf %107, %85 : vector<8x16xf32>
    %109 = math.exp %108 : vector<8x16xf32>
    %110 = arith.mulf %105, %109 : vector<8x16xf32>
    %cst_45 = arith.constant 1.000000e+00 : f32
    %111 = vector.broadcast %cst_45 : f32 to vector<8x16xf32>
    %112 = arith.subf %111, %110 : vector<8x16xf32>
    %113 = arith.mulf %84, %112 : vector<8x16xf32>
    %cst_46 = arith.constant 1.000000e+00 : f32
    %114 = vector.broadcast %cst_46 : f32 to vector<8x16xf32>
    %115 = arith.addf %114, %113 : vector<8x16xf32>
    %116 = arith.mulf %77, %115 : vector<8x16xf32>
    %c0_47 = arith.constant 0 : index
    %c0_48 = arith.constant 0 : index
    %117 = vector.load %arg3[%c0_47, %c0_48] : memref<144x384xf32, #tpu.memory_space<vmem>>, vector<16x384xf32>
    %c32 = arith.constant 32 : index
    %c0_49 = arith.constant 0 : index
    %118 = vector.load %arg3[%c32, %c0_49] : memref<144x384xf32, #tpu.memory_space<vmem>>, vector<32x384xf32>
    %c64 = arith.constant 64 : index
    %c0_50 = arith.constant 0 : index
    %119 = vector.load %arg3[%c64, %c0_50] : memref<144x384xf32, #tpu.memory_space<vmem>>, vector<1x384xf32>
    %c65 = arith.constant 65 : index
    %c0_51 = arith.constant 0 : index
    %120 = vector.load %arg3[%c65, %c0_51] : memref<144x384xf32, #tpu.memory_space<vmem>>, vector<1x32xf32>
    %cst_52 = arith.constant dense<0.000000e+00> : vector<8x384xf32>
    %121 = tpu.matmul %116, %117, %cst_52 {dimension_numbers = #tpu.dot_dimension_numbers<[1], [0], [0], [1], [0, 0, 1, 1], [], []>} : vector<8x16xf32>, vector<16x384xf32>, vector<8x384xf32> -> vector<8x384xf32>
    %122 = vector.broadcast %119 : vector<1x384xf32> to vector<8x384xf32>
    %123 = arith.addf %121, %122 : vector<8x384xf32>
    %124 = vector.extract_strided_slice %123 {offsets = [0, 0], sizes = [1, 256], strides = [1, 1]} : vector<8x384xf32> to vector<1x256xf32>
    %125 = vector.extract_strided_slice %123 {offsets = [1, 0], sizes = [1, 256], strides = [1, 1]} : vector<8x384xf32> to vector<1x256xf32>
    %126 = vector.extract_strided_slice %123 {offsets = [2, 0], sizes = [1, 256], strides = [1, 1]} : vector<8x384xf32> to vector<1x256xf32>
    %127 = vector.extract_strided_slice %123 {offsets = [3, 0], sizes = [1, 256], strides = [1, 1]} : vector<8x384xf32> to vector<1x256xf32>
    %128 = vector.extract_strided_slice %123 {offsets = [4, 0], sizes = [1, 256], strides = [1, 1]} : vector<8x384xf32> to vector<1x256xf32>
    %129 = vector.extract_strided_slice %123 {offsets = [5, 0], sizes = [1, 256], strides = [1, 1]} : vector<8x384xf32> to vector<1x256xf32>
    %130 = vector.extract_strided_slice %123 {offsets = [6, 0], sizes = [1, 256], strides = [1, 1]} : vector<8x384xf32> to vector<1x256xf32>
    %131 = vector.extract_strided_slice %123 {offsets = [7, 0], sizes = [1, 256], strides = [1, 1]} : vector<8x384xf32> to vector<1x256xf32>
    %132 = vector.extract_strided_slice %123 {offsets = [0, 256], sizes = [1, 32], strides = [1, 1]} : vector<8x384xf32> to vector<1x32xf32>
    %133 = vector.extract_strided_slice %123 {offsets = [1, 256], sizes = [1, 32], strides = [1, 1]} : vector<8x384xf32> to vector<1x32xf32>
    %134 = vector.extract_strided_slice %123 {offsets = [2, 256], sizes = [1, 32], strides = [1, 1]} : vector<8x384xf32> to vector<1x32xf32>
    %135 = vector.extract_strided_slice %123 {offsets = [3, 256], sizes = [1, 32], strides = [1, 1]} : vector<8x384xf32> to vector<1x32xf32>
    %136 = vector.extract_strided_slice %123 {offsets = [4, 256], sizes = [1, 32], strides = [1, 1]} : vector<8x384xf32> to vector<1x32xf32>
    %137 = vector.extract_strided_slice %123 {offsets = [5, 256], sizes = [1, 32], strides = [1, 1]} : vector<8x384xf32> to vector<1x32xf32>
    %138 = vector.extract_strided_slice %123 {offsets = [6, 256], sizes = [1, 32], strides = [1, 1]} : vector<8x384xf32> to vector<1x32xf32>
    %139 = vector.extract_strided_slice %123 {offsets = [7, 256], sizes = [1, 32], strides = [1, 1]} : vector<8x384xf32> to vector<1x32xf32>
    %c0_53 = arith.constant 0 : index
    %c0_54 = arith.constant 0 : index
    %140 = vector.load %arg1[%c0_53, %c0_54] : memref<2x32xf32, #tpu.memory_space<vmem>>, vector<1x32xf32>
    %cst_55 = arith.constant dense<0.000000e+00> : vector<1x384xf32>
    %141 = tpu.matmul %140, %118, %cst_55 {dimension_numbers = #tpu.dot_dimension_numbers<[1], [0], [0], [1], [0, 0, 1, 1], [], []>} : vector<1x32xf32>, vector<32x384xf32>, vector<1x384xf32> -> vector<1x384xf32>
    %142 = vector.extract_strided_slice %141 {offsets = [0, 0], sizes = [1, 256], strides = [1, 1]} : vector<1x384xf32> to vector<1x256xf32>
    %143 = arith.addf %124, %142 : vector<1x256xf32>
    %cst_56 = arith.constant 5.000000e-01 : f32
    %144 = vector.broadcast %cst_56 : f32 to vector<1x256xf32>
    %145 = arith.mulf %144, %143 : vector<1x256xf32>
    %146 = math.tanh %145 : vector<1x256xf32>
    %cst_57 = arith.constant 1.000000e+00 : f32
    %147 = vector.broadcast %cst_57 : f32 to vector<1x256xf32>
    %148 = arith.addf %146, %147 : vector<1x256xf32>
    %cst_58 = arith.constant 5.000000e-01 : f32
    %149 = vector.broadcast %cst_58 : f32 to vector<1x256xf32>
    %150 = arith.mulf %149, %148 : vector<1x256xf32>
    %151 = vector.extract_strided_slice %150 {offsets = [0, 0], sizes = [1, 32], strides = [1, 1]} : vector<1x256xf32> to vector<1x32xf32>
    %152 = vector.extract_strided_slice %150 {offsets = [0, 128], sizes = [1, 32], strides = [1, 1]} : vector<1x256xf32> to vector<1x32xf32>
    %153 = vector.extract_strided_slice %141 {offsets = [0, 256], sizes = [1, 32], strides = [1, 1]} : vector<1x384xf32> to vector<1x32xf32>
    %154 = arith.addf %153, %120 : vector<1x32xf32>
    %155 = arith.mulf %151, %154 : vector<1x32xf32>
    %156 = arith.addf %132, %155 : vector<1x32xf32>
    %157 = math.tanh %156 : vector<1x32xf32>
    %cst_59 = arith.constant 1.000000e+00 : f32
    %158 = vector.broadcast %cst_59 : f32 to vector<1x32xf32>
    %159 = arith.subf %158, %152 : vector<1x32xf32>
    %160 = arith.mulf %159, %157 : vector<1x32xf32>
    %161 = arith.mulf %152, %140 : vector<1x32xf32>
    %162 = arith.addf %160, %161 : vector<1x32xf32>
    %cst_60 = arith.constant dense<0.000000e+00> : vector<1x384xf32>
    %163 = tpu.matmul %162, %118, %cst_60 {dimension_numbers = #tpu.dot_dimension_numbers<[1], [0], [0], [1], [0, 0, 1, 1], [], []>} : vector<1x32xf32>, vector<32x384xf32>, vector<1x384xf32> -> vector<1x384xf32>
    %164 = vector.extract_strided_slice %163 {offsets = [0, 0], sizes = [1, 256], strides = [1, 1]} : vector<1x384xf32> to vector<1x256xf32>
    %165 = arith.addf %125, %164 : vector<1x256xf32>
    %cst_61 = arith.constant 5.000000e-01 : f32
    %166 = vector.broadcast %cst_61 : f32 to vector<1x256xf32>
    %167 = arith.mulf %166, %165 : vector<1x256xf32>
    %168 = math.tanh %167 : vector<1x256xf32>
    %cst_62 = arith.constant 1.000000e+00 : f32
    %169 = vector.broadcast %cst_62 : f32 to vector<1x256xf32>
    %170 = arith.addf %168, %169 : vector<1x256xf32>
    %cst_63 = arith.constant 5.000000e-01 : f32
    %171 = vector.broadcast %cst_63 : f32 to vector<1x256xf32>
    %172 = arith.mulf %171, %170 : vector<1x256xf32>
    %173 = vector.extract_strided_slice %172 {offsets = [0, 0], sizes = [1, 32], strides = [1, 1]} : vector<1x256xf32> to vector<1x32xf32>
    %174 = vector.extract_strided_slice %172 {offsets = [0, 128], sizes = [1, 32], strides = [1, 1]} : vector<1x256xf32> to vector<1x32xf32>
    %175 = vector.extract_strided_slice %163 {offsets = [0, 256], sizes = [1, 32], strides = [1, 1]} : vector<1x384xf32> to vector<1x32xf32>
    %176 = arith.addf %175, %120 : vector<1x32xf32>
    %177 = arith.mulf %173, %176 : vector<1x32xf32>
    %178 = arith.addf %133, %177 : vector<1x32xf32>
    %179 = math.tanh %178 : vector<1x32xf32>
    %cst_64 = arith.constant 1.000000e+00 : f32
    %180 = vector.broadcast %cst_64 : f32 to vector<1x32xf32>
    %181 = arith.subf %180, %174 : vector<1x32xf32>
    %182 = arith.mulf %181, %179 : vector<1x32xf32>
    %183 = arith.mulf %174, %162 : vector<1x32xf32>
    %184 = arith.addf %182, %183 : vector<1x32xf32>
    %cst_65 = arith.constant dense<0.000000e+00> : vector<1x384xf32>
    %185 = tpu.matmul %184, %118, %cst_65 {dimension_numbers = #tpu.dot_dimension_numbers<[1], [0], [0], [1], [0, 0, 1, 1], [], []>} : vector<1x32xf32>, vector<32x384xf32>, vector<1x384xf32> -> vector<1x384xf32>
    %186 = vector.extract_strided_slice %185 {offsets = [0, 0], sizes = [1, 256], strides = [1, 1]} : vector<1x384xf32> to vector<1x256xf32>
    %187 = arith.addf %126, %186 : vector<1x256xf32>
    %cst_66 = arith.constant 5.000000e-01 : f32
    %188 = vector.broadcast %cst_66 : f32 to vector<1x256xf32>
    %189 = arith.mulf %188, %187 : vector<1x256xf32>
    %190 = math.tanh %189 : vector<1x256xf32>
    %cst_67 = arith.constant 1.000000e+00 : f32
    %191 = vector.broadcast %cst_67 : f32 to vector<1x256xf32>
    %192 = arith.addf %190, %191 : vector<1x256xf32>
    %cst_68 = arith.constant 5.000000e-01 : f32
    %193 = vector.broadcast %cst_68 : f32 to vector<1x256xf32>
    %194 = arith.mulf %193, %192 : vector<1x256xf32>
    %195 = vector.extract_strided_slice %194 {offsets = [0, 0], sizes = [1, 32], strides = [1, 1]} : vector<1x256xf32> to vector<1x32xf32>
    %196 = vector.extract_strided_slice %194 {offsets = [0, 128], sizes = [1, 32], strides = [1, 1]} : vector<1x256xf32> to vector<1x32xf32>
    %197 = vector.extract_strided_slice %185 {offsets = [0, 256], sizes = [1, 32], strides = [1, 1]} : vector<1x384xf32> to vector<1x32xf32>
    %198 = arith.addf %197, %120 : vector<1x32xf32>
    %199 = arith.mulf %195, %198 : vector<1x32xf32>
    %200 = arith.addf %134, %199 : vector<1x32xf32>
    %201 = math.tanh %200 : vector<1x32xf32>
    %cst_69 = arith.constant 1.000000e+00 : f32
    %202 = vector.broadcast %cst_69 : f32 to vector<1x32xf32>
    %203 = arith.subf %202, %196 : vector<1x32xf32>
    %204 = arith.mulf %203, %201 : vector<1x32xf32>
    %205 = arith.mulf %196, %184 : vector<1x32xf32>
    %206 = arith.addf %204, %205 : vector<1x32xf32>
    %cst_70 = arith.constant dense<0.000000e+00> : vector<1x384xf32>
    %207 = tpu.matmul %206, %118, %cst_70 {dimension_numbers = #tpu.dot_dimension_numbers<[1], [0], [0], [1], [0, 0, 1, 1], [], []>} : vector<1x32xf32>, vector<32x384xf32>, vector<1x384xf32> -> vector<1x384xf32>
    %208 = vector.extract_strided_slice %207 {offsets = [0, 0], sizes = [1, 256], strides = [1, 1]} : vector<1x384xf32> to vector<1x256xf32>
    %209 = arith.addf %127, %208 : vector<1x256xf32>
    %cst_71 = arith.constant 5.000000e-01 : f32
    %210 = vector.broadcast %cst_71 : f32 to vector<1x256xf32>
    %211 = arith.mulf %210, %209 : vector<1x256xf32>
    %212 = math.tanh %211 : vector<1x256xf32>
    %cst_72 = arith.constant 1.000000e+00 : f32
    %213 = vector.broadcast %cst_72 : f32 to vector<1x256xf32>
    %214 = arith.addf %212, %213 : vector<1x256xf32>
    %cst_73 = arith.constant 5.000000e-01 : f32
    %215 = vector.broadcast %cst_73 : f32 to vector<1x256xf32>
    %216 = arith.mulf %215, %214 : vector<1x256xf32>
    %217 = vector.extract_strided_slice %216 {offsets = [0, 0], sizes = [1, 32], strides = [1, 1]} : vector<1x256xf32> to vector<1x32xf32>
    %218 = vector.extract_strided_slice %216 {offsets = [0, 128], sizes = [1, 32], strides = [1, 1]} : vector<1x256xf32> to vector<1x32xf32>
    %219 = vector.extract_strided_slice %207 {offsets = [0, 256], sizes = [1, 32], strides = [1, 1]} : vector<1x384xf32> to vector<1x32xf32>
    %220 = arith.addf %219, %120 : vector<1x32xf32>
    %221 = arith.mulf %217, %220 : vector<1x32xf32>
    %222 = arith.addf %135, %221 : vector<1x32xf32>
    %223 = math.tanh %222 : vector<1x32xf32>
    %cst_74 = arith.constant 1.000000e+00 : f32
    %224 = vector.broadcast %cst_74 : f32 to vector<1x32xf32>
    %225 = arith.subf %224, %218 : vector<1x32xf32>
    %226 = arith.mulf %225, %223 : vector<1x32xf32>
    %227 = arith.mulf %218, %206 : vector<1x32xf32>
    %228 = arith.addf %226, %227 : vector<1x32xf32>
    %cst_75 = arith.constant dense<0.000000e+00> : vector<1x384xf32>
    %229 = tpu.matmul %228, %118, %cst_75 {dimension_numbers = #tpu.dot_dimension_numbers<[1], [0], [0], [1], [0, 0, 1, 1], [], []>} : vector<1x32xf32>, vector<32x384xf32>, vector<1x384xf32> -> vector<1x384xf32>
    %230 = vector.extract_strided_slice %229 {offsets = [0, 0], sizes = [1, 256], strides = [1, 1]} : vector<1x384xf32> to vector<1x256xf32>
    %231 = arith.addf %128, %230 : vector<1x256xf32>
    %cst_76 = arith.constant 5.000000e-01 : f32
    %232 = vector.broadcast %cst_76 : f32 to vector<1x256xf32>
    %233 = arith.mulf %232, %231 : vector<1x256xf32>
    %234 = math.tanh %233 : vector<1x256xf32>
    %cst_77 = arith.constant 1.000000e+00 : f32
    %235 = vector.broadcast %cst_77 : f32 to vector<1x256xf32>
    %236 = arith.addf %234, %235 : vector<1x256xf32>
    %cst_78 = arith.constant 5.000000e-01 : f32
    %237 = vector.broadcast %cst_78 : f32 to vector<1x256xf32>
    %238 = arith.mulf %237, %236 : vector<1x256xf32>
    %239 = vector.extract_strided_slice %238 {offsets = [0, 0], sizes = [1, 32], strides = [1, 1]} : vector<1x256xf32> to vector<1x32xf32>
    %240 = vector.extract_strided_slice %238 {offsets = [0, 128], sizes = [1, 32], strides = [1, 1]} : vector<1x256xf32> to vector<1x32xf32>
    %241 = vector.extract_strided_slice %229 {offsets = [0, 256], sizes = [1, 32], strides = [1, 1]} : vector<1x384xf32> to vector<1x32xf32>
    %242 = arith.addf %241, %120 : vector<1x32xf32>
    %243 = arith.mulf %239, %242 : vector<1x32xf32>
    %244 = arith.addf %136, %243 : vector<1x32xf32>
    %245 = math.tanh %244 : vector<1x32xf32>
    %cst_79 = arith.constant 1.000000e+00 : f32
    %246 = vector.broadcast %cst_79 : f32 to vector<1x32xf32>
    %247 = arith.subf %246, %240 : vector<1x32xf32>
    %248 = arith.mulf %247, %245 : vector<1x32xf32>
    %249 = arith.mulf %240, %228 : vector<1x32xf32>
    %250 = arith.addf %248, %249 : vector<1x32xf32>
    %cst_80 = arith.constant dense<0.000000e+00> : vector<1x384xf32>
    %251 = tpu.matmul %250, %118, %cst_80 {dimension_numbers = #tpu.dot_dimension_numbers<[1], [0], [0], [1], [0, 0, 1, 1], [], []>} : vector<1x32xf32>, vector<32x384xf32>, vector<1x384xf32> -> vector<1x384xf32>
    %252 = vector.extract_strided_slice %251 {offsets = [0, 0], sizes = [1, 256], strides = [1, 1]} : vector<1x384xf32> to vector<1x256xf32>
    %253 = arith.addf %129, %252 : vector<1x256xf32>
    %cst_81 = arith.constant 5.000000e-01 : f32
    %254 = vector.broadcast %cst_81 : f32 to vector<1x256xf32>
    %255 = arith.mulf %254, %253 : vector<1x256xf32>
    %256 = math.tanh %255 : vector<1x256xf32>
    %cst_82 = arith.constant 1.000000e+00 : f32
    %257 = vector.broadcast %cst_82 : f32 to vector<1x256xf32>
    %258 = arith.addf %256, %257 : vector<1x256xf32>
    %cst_83 = arith.constant 5.000000e-01 : f32
    %259 = vector.broadcast %cst_83 : f32 to vector<1x256xf32>
    %260 = arith.mulf %259, %258 : vector<1x256xf32>
    %261 = vector.extract_strided_slice %260 {offsets = [0, 0], sizes = [1, 32], strides = [1, 1]} : vector<1x256xf32> to vector<1x32xf32>
    %262 = vector.extract_strided_slice %260 {offsets = [0, 128], sizes = [1, 32], strides = [1, 1]} : vector<1x256xf32> to vector<1x32xf32>
    %263 = vector.extract_strided_slice %251 {offsets = [0, 256], sizes = [1, 32], strides = [1, 1]} : vector<1x384xf32> to vector<1x32xf32>
    %264 = arith.addf %263, %120 : vector<1x32xf32>
    %265 = arith.mulf %261, %264 : vector<1x32xf32>
    %266 = arith.addf %137, %265 : vector<1x32xf32>
    %267 = math.tanh %266 : vector<1x32xf32>
    %cst_84 = arith.constant 1.000000e+00 : f32
    %268 = vector.broadcast %cst_84 : f32 to vector<1x32xf32>
    %269 = arith.subf %268, %262 : vector<1x32xf32>
    %270 = arith.mulf %269, %267 : vector<1x32xf32>
    %271 = arith.mulf %262, %250 : vector<1x32xf32>
    %272 = arith.addf %270, %271 : vector<1x32xf32>
    %cst_85 = arith.constant dense<0.000000e+00> : vector<1x384xf32>
    %273 = tpu.matmul %272, %118, %cst_85 {dimension_numbers = #tpu.dot_dimension_numbers<[1], [0], [0], [1], [0, 0, 1, 1], [], []>} : vector<1x32xf32>, vector<32x384xf32>, vector<1x384xf32> -> vector<1x384xf32>
    %274 = vector.extract_strided_slice %273 {offsets = [0, 0], sizes = [1, 256], strides = [1, 1]} : vector<1x384xf32> to vector<1x256xf32>
    %275 = arith.addf %130, %274 : vector<1x256xf32>
    %cst_86 = arith.constant 5.000000e-01 : f32
    %276 = vector.broadcast %cst_86 : f32 to vector<1x256xf32>
    %277 = arith.mulf %276, %275 : vector<1x256xf32>
    %278 = math.tanh %277 : vector<1x256xf32>
    %cst_87 = arith.constant 1.000000e+00 : f32
    %279 = vector.broadcast %cst_87 : f32 to vector<1x256xf32>
    %280 = arith.addf %278, %279 : vector<1x256xf32>
    %cst_88 = arith.constant 5.000000e-01 : f32
    %281 = vector.broadcast %cst_88 : f32 to vector<1x256xf32>
    %282 = arith.mulf %281, %280 : vector<1x256xf32>
    %283 = vector.extract_strided_slice %282 {offsets = [0, 0], sizes = [1, 32], strides = [1, 1]} : vector<1x256xf32> to vector<1x32xf32>
    %284 = vector.extract_strided_slice %282 {offsets = [0, 128], sizes = [1, 32], strides = [1, 1]} : vector<1x256xf32> to vector<1x32xf32>
    %285 = vector.extract_strided_slice %273 {offsets = [0, 256], sizes = [1, 32], strides = [1, 1]} : vector<1x384xf32> to vector<1x32xf32>
    %286 = arith.addf %285, %120 : vector<1x32xf32>
    %287 = arith.mulf %283, %286 : vector<1x32xf32>
    %288 = arith.addf %138, %287 : vector<1x32xf32>
    %289 = math.tanh %288 : vector<1x32xf32>
    %cst_89 = arith.constant 1.000000e+00 : f32
    %290 = vector.broadcast %cst_89 : f32 to vector<1x32xf32>
    %291 = arith.subf %290, %284 : vector<1x32xf32>
    %292 = arith.mulf %291, %289 : vector<1x32xf32>
    %293 = arith.mulf %284, %272 : vector<1x32xf32>
    %294 = arith.addf %292, %293 : vector<1x32xf32>
    %cst_90 = arith.constant dense<0.000000e+00> : vector<1x384xf32>
    %295 = tpu.matmul %294, %118, %cst_90 {dimension_numbers = #tpu.dot_dimension_numbers<[1], [0], [0], [1], [0, 0, 1, 1], [], []>} : vector<1x32xf32>, vector<32x384xf32>, vector<1x384xf32> -> vector<1x384xf32>
    %296 = vector.extract_strided_slice %295 {offsets = [0, 0], sizes = [1, 256], strides = [1, 1]} : vector<1x384xf32> to vector<1x256xf32>
    %297 = arith.addf %131, %296 : vector<1x256xf32>
    %cst_91 = arith.constant 5.000000e-01 : f32
    %298 = vector.broadcast %cst_91 : f32 to vector<1x256xf32>
    %299 = arith.mulf %298, %297 : vector<1x256xf32>
    %300 = math.tanh %299 : vector<1x256xf32>
    %cst_92 = arith.constant 1.000000e+00 : f32
    %301 = vector.broadcast %cst_92 : f32 to vector<1x256xf32>
    %302 = arith.addf %300, %301 : vector<1x256xf32>
    %cst_93 = arith.constant 5.000000e-01 : f32
    %303 = vector.broadcast %cst_93 : f32 to vector<1x256xf32>
    %304 = arith.mulf %303, %302 : vector<1x256xf32>
    %305 = vector.extract_strided_slice %304 {offsets = [0, 0], sizes = [1, 32], strides = [1, 1]} : vector<1x256xf32> to vector<1x32xf32>
    %306 = vector.extract_strided_slice %304 {offsets = [0, 128], sizes = [1, 32], strides = [1, 1]} : vector<1x256xf32> to vector<1x32xf32>
    %307 = vector.extract_strided_slice %295 {offsets = [0, 256], sizes = [1, 32], strides = [1, 1]} : vector<1x384xf32> to vector<1x32xf32>
    %308 = arith.addf %307, %120 : vector<1x32xf32>
    %309 = arith.mulf %305, %308 : vector<1x32xf32>
    %310 = arith.addf %139, %309 : vector<1x32xf32>
    %311 = math.tanh %310 : vector<1x32xf32>
    %cst_94 = arith.constant 1.000000e+00 : f32
    %312 = vector.broadcast %cst_94 : f32 to vector<1x32xf32>
    %313 = arith.subf %312, %306 : vector<1x32xf32>
    %314 = arith.mulf %313, %311 : vector<1x32xf32>
    %315 = arith.mulf %306, %294 : vector<1x32xf32>
    %316 = arith.addf %314, %315 : vector<1x32xf32>
    %317 = tpu.concatenate %162, %184, %206, %228, %250, %272, %294, %316 in 0 : vector<1x32xf32>, vector<1x32xf32>, vector<1x32xf32>, vector<1x32xf32>, vector<1x32xf32>, vector<1x32xf32>, vector<1x32xf32>, vector<1x32xf32> -> vector<8x32xf32>
    %c72 = arith.constant 72 : index
    %c0_95 = arith.constant 0 : index
    %318 = vector.load %arg3[%c72, %c0_95] : memref<144x384xf32, #tpu.memory_space<vmem>>, vector<32x384xf32>
    %c104 = arith.constant 104 : index
    %c0_96 = arith.constant 0 : index
    %319 = vector.load %arg3[%c104, %c0_96] : memref<144x384xf32, #tpu.memory_space<vmem>>, vector<32x384xf32>
    %c136 = arith.constant 136 : index
    %c0_97 = arith.constant 0 : index
    %320 = vector.load %arg3[%c136, %c0_97] : memref<144x384xf32, #tpu.memory_space<vmem>>, vector<1x384xf32>
    %c137 = arith.constant 137 : index
    %c0_98 = arith.constant 0 : index
    %321 = vector.load %arg3[%c137, %c0_98] : memref<144x384xf32, #tpu.memory_space<vmem>>, vector<1x32xf32>
    %cst_99 = arith.constant dense<0.000000e+00> : vector<8x384xf32>
    %322 = tpu.matmul %317, %318, %cst_99 {dimension_numbers = #tpu.dot_dimension_numbers<[1], [0], [0], [1], [0, 0, 1, 1], [], []>} : vector<8x32xf32>, vector<32x384xf32>, vector<8x384xf32> -> vector<8x384xf32>
    %323 = vector.broadcast %320 : vector<1x384xf32> to vector<8x384xf32>
    %324 = arith.addf %322, %323 : vector<8x384xf32>
    %325 = vector.extract_strided_slice %324 {offsets = [0, 0], sizes = [1, 256], strides = [1, 1]} : vector<8x384xf32> to vector<1x256xf32>
    %326 = vector.extract_strided_slice %324 {offsets = [1, 0], sizes = [1, 256], strides = [1, 1]} : vector<8x384xf32> to vector<1x256xf32>
    %327 = vector.extract_strided_slice %324 {offsets = [2, 0], sizes = [1, 256], strides = [1, 1]} : vector<8x384xf32> to vector<1x256xf32>
    %328 = vector.extract_strided_slice %324 {offsets = [3, 0], sizes = [1, 256], strides = [1, 1]} : vector<8x384xf32> to vector<1x256xf32>
    %329 = vector.extract_strided_slice %324 {offsets = [4, 0], sizes = [1, 256], strides = [1, 1]} : vector<8x384xf32> to vector<1x256xf32>
    %330 = vector.extract_strided_slice %324 {offsets = [5, 0], sizes = [1, 256], strides = [1, 1]} : vector<8x384xf32> to vector<1x256xf32>
    %331 = vector.extract_strided_slice %324 {offsets = [6, 0], sizes = [1, 256], strides = [1, 1]} : vector<8x384xf32> to vector<1x256xf32>
    %332 = vector.extract_strided_slice %324 {offsets = [7, 0], sizes = [1, 256], strides = [1, 1]} : vector<8x384xf32> to vector<1x256xf32>
    %333 = vector.extract_strided_slice %324 {offsets = [0, 256], sizes = [1, 32], strides = [1, 1]} : vector<8x384xf32> to vector<1x32xf32>
    %334 = vector.extract_strided_slice %324 {offsets = [1, 256], sizes = [1, 32], strides = [1, 1]} : vector<8x384xf32> to vector<1x32xf32>
    %335 = vector.extract_strided_slice %324 {offsets = [2, 256], sizes = [1, 32], strides = [1, 1]} : vector<8x384xf32> to vector<1x32xf32>
    %336 = vector.extract_strided_slice %324 {offsets = [3, 256], sizes = [1, 32], strides = [1, 1]} : vector<8x384xf32> to vector<1x32xf32>
    %337 = vector.extract_strided_slice %324 {offsets = [4, 256], sizes = [1, 32], strides = [1, 1]} : vector<8x384xf32> to vector<1x32xf32>
    %338 = vector.extract_strided_slice %324 {offsets = [5, 256], sizes = [1, 32], strides = [1, 1]} : vector<8x384xf32> to vector<1x32xf32>
    %339 = vector.extract_strided_slice %324 {offsets = [6, 256], sizes = [1, 32], strides = [1, 1]} : vector<8x384xf32> to vector<1x32xf32>
    %340 = vector.extract_strided_slice %324 {offsets = [7, 256], sizes = [1, 32], strides = [1, 1]} : vector<8x384xf32> to vector<1x32xf32>
    %c1 = arith.constant 1 : index
    %c0_100 = arith.constant 0 : index
    %341 = vector.load %arg1[%c1, %c0_100] : memref<2x32xf32, #tpu.memory_space<vmem>>, vector<1x32xf32>
    %cst_101 = arith.constant dense<0.000000e+00> : vector<1x384xf32>
    %342 = tpu.matmul %341, %319, %cst_101 {dimension_numbers = #tpu.dot_dimension_numbers<[1], [0], [0], [1], [0, 0, 1, 1], [], []>} : vector<1x32xf32>, vector<32x384xf32>, vector<1x384xf32> -> vector<1x384xf32>
    %343 = vector.extract_strided_slice %342 {offsets = [0, 0], sizes = [1, 256], strides = [1, 1]} : vector<1x384xf32> to vector<1x256xf32>
    %344 = arith.addf %325, %343 : vector<1x256xf32>
    %cst_102 = arith.constant 5.000000e-01 : f32
    %345 = vector.broadcast %cst_102 : f32 to vector<1x256xf32>
    %346 = arith.mulf %345, %344 : vector<1x256xf32>
    %347 = math.tanh %346 : vector<1x256xf32>
    %cst_103 = arith.constant 1.000000e+00 : f32
    %348 = vector.broadcast %cst_103 : f32 to vector<1x256xf32>
    %349 = arith.addf %347, %348 : vector<1x256xf32>
    %cst_104 = arith.constant 5.000000e-01 : f32
    %350 = vector.broadcast %cst_104 : f32 to vector<1x256xf32>
    %351 = arith.mulf %350, %349 : vector<1x256xf32>
    %352 = vector.extract_strided_slice %351 {offsets = [0, 0], sizes = [1, 32], strides = [1, 1]} : vector<1x256xf32> to vector<1x32xf32>
    %353 = vector.extract_strided_slice %351 {offsets = [0, 128], sizes = [1, 32], strides = [1, 1]} : vector<1x256xf32> to vector<1x32xf32>
    %354 = vector.extract_strided_slice %342 {offsets = [0, 256], sizes = [1, 32], strides = [1, 1]} : vector<1x384xf32> to vector<1x32xf32>
    %355 = arith.addf %354, %321 : vector<1x32xf32>
    %356 = arith.mulf %352, %355 : vector<1x32xf32>
    %357 = arith.addf %333, %356 : vector<1x32xf32>
    %358 = math.tanh %357 : vector<1x32xf32>
    %cst_105 = arith.constant 1.000000e+00 : f32
    %359 = vector.broadcast %cst_105 : f32 to vector<1x32xf32>
    %360 = arith.subf %359, %353 : vector<1x32xf32>
    %361 = arith.mulf %360, %358 : vector<1x32xf32>
    %362 = arith.mulf %353, %341 : vector<1x32xf32>
    %363 = arith.addf %361, %362 : vector<1x32xf32>
    %cst_106 = arith.constant dense<0.000000e+00> : vector<1x384xf32>
    %364 = tpu.matmul %363, %319, %cst_106 {dimension_numbers = #tpu.dot_dimension_numbers<[1], [0], [0], [1], [0, 0, 1, 1], [], []>} : vector<1x32xf32>, vector<32x384xf32>, vector<1x384xf32> -> vector<1x384xf32>
    %365 = vector.extract_strided_slice %364 {offsets = [0, 0], sizes = [1, 256], strides = [1, 1]} : vector<1x384xf32> to vector<1x256xf32>
    %366 = arith.addf %326, %365 : vector<1x256xf32>
    %cst_107 = arith.constant 5.000000e-01 : f32
    %367 = vector.broadcast %cst_107 : f32 to vector<1x256xf32>
    %368 = arith.mulf %367, %366 : vector<1x256xf32>
    %369 = math.tanh %368 : vector<1x256xf32>
    %cst_108 = arith.constant 1.000000e+00 : f32
    %370 = vector.broadcast %cst_108 : f32 to vector<1x256xf32>
    %371 = arith.addf %369, %370 : vector<1x256xf32>
    %cst_109 = arith.constant 5.000000e-01 : f32
    %372 = vector.broadcast %cst_109 : f32 to vector<1x256xf32>
    %373 = arith.mulf %372, %371 : vector<1x256xf32>
    %374 = vector.extract_strided_slice %373 {offsets = [0, 0], sizes = [1, 32], strides = [1, 1]} : vector<1x256xf32> to vector<1x32xf32>
    %375 = vector.extract_strided_slice %373 {offsets = [0, 128], sizes = [1, 32], strides = [1, 1]} : vector<1x256xf32> to vector<1x32xf32>
    %376 = vector.extract_strided_slice %364 {offsets = [0, 256], sizes = [1, 32], strides = [1, 1]} : vector<1x384xf32> to vector<1x32xf32>
    %377 = arith.addf %376, %321 : vector<1x32xf32>
    %378 = arith.mulf %374, %377 : vector<1x32xf32>
    %379 = arith.addf %334, %378 : vector<1x32xf32>
    %380 = math.tanh %379 : vector<1x32xf32>
    %cst_110 = arith.constant 1.000000e+00 : f32
    %381 = vector.broadcast %cst_110 : f32 to vector<1x32xf32>
    %382 = arith.subf %381, %375 : vector<1x32xf32>
    %383 = arith.mulf %382, %380 : vector<1x32xf32>
    %384 = arith.mulf %375, %363 : vector<1x32xf32>
    %385 = arith.addf %383, %384 : vector<1x32xf32>
    %cst_111 = arith.constant dense<0.000000e+00> : vector<1x384xf32>
    %386 = tpu.matmul %385, %319, %cst_111 {dimension_numbers = #tpu.dot_dimension_numbers<[1], [0], [0], [1], [0, 0, 1, 1], [], []>} : vector<1x32xf32>, vector<32x384xf32>, vector<1x384xf32> -> vector<1x384xf32>
    %387 = vector.extract_strided_slice %386 {offsets = [0, 0], sizes = [1, 256], strides = [1, 1]} : vector<1x384xf32> to vector<1x256xf32>
    %388 = arith.addf %327, %387 : vector<1x256xf32>
    %cst_112 = arith.constant 5.000000e-01 : f32
    %389 = vector.broadcast %cst_112 : f32 to vector<1x256xf32>
    %390 = arith.mulf %389, %388 : vector<1x256xf32>
    %391 = math.tanh %390 : vector<1x256xf32>
    %cst_113 = arith.constant 1.000000e+00 : f32
    %392 = vector.broadcast %cst_113 : f32 to vector<1x256xf32>
    %393 = arith.addf %391, %392 : vector<1x256xf32>
    %cst_114 = arith.constant 5.000000e-01 : f32
    %394 = vector.broadcast %cst_114 : f32 to vector<1x256xf32>
    %395 = arith.mulf %394, %393 : vector<1x256xf32>
    %396 = vector.extract_strided_slice %395 {offsets = [0, 0], sizes = [1, 32], strides = [1, 1]} : vector<1x256xf32> to vector<1x32xf32>
    %397 = vector.extract_strided_slice %395 {offsets = [0, 128], sizes = [1, 32], strides = [1, 1]} : vector<1x256xf32> to vector<1x32xf32>
    %398 = vector.extract_strided_slice %386 {offsets = [0, 256], sizes = [1, 32], strides = [1, 1]} : vector<1x384xf32> to vector<1x32xf32>
    %399 = arith.addf %398, %321 : vector<1x32xf32>
    %400 = arith.mulf %396, %399 : vector<1x32xf32>
    %401 = arith.addf %335, %400 : vector<1x32xf32>
    %402 = math.tanh %401 : vector<1x32xf32>
    %cst_115 = arith.constant 1.000000e+00 : f32
    %403 = vector.broadcast %cst_115 : f32 to vector<1x32xf32>
    %404 = arith.subf %403, %397 : vector<1x32xf32>
    %405 = arith.mulf %404, %402 : vector<1x32xf32>
    %406 = arith.mulf %397, %385 : vector<1x32xf32>
    %407 = arith.addf %405, %406 : vector<1x32xf32>
    %cst_116 = arith.constant dense<0.000000e+00> : vector<1x384xf32>
    %408 = tpu.matmul %407, %319, %cst_116 {dimension_numbers = #tpu.dot_dimension_numbers<[1], [0], [0], [1], [0, 0, 1, 1], [], []>} : vector<1x32xf32>, vector<32x384xf32>, vector<1x384xf32> -> vector<1x384xf32>
    %409 = vector.extract_strided_slice %408 {offsets = [0, 0], sizes = [1, 256], strides = [1, 1]} : vector<1x384xf32> to vector<1x256xf32>
    %410 = arith.addf %328, %409 : vector<1x256xf32>
    %cst_117 = arith.constant 5.000000e-01 : f32
    %411 = vector.broadcast %cst_117 : f32 to vector<1x256xf32>
    %412 = arith.mulf %411, %410 : vector<1x256xf32>
    %413 = math.tanh %412 : vector<1x256xf32>
    %cst_118 = arith.constant 1.000000e+00 : f32
    %414 = vector.broadcast %cst_118 : f32 to vector<1x256xf32>
    %415 = arith.addf %413, %414 : vector<1x256xf32>
    %cst_119 = arith.constant 5.000000e-01 : f32
    %416 = vector.broadcast %cst_119 : f32 to vector<1x256xf32>
    %417 = arith.mulf %416, %415 : vector<1x256xf32>
    %418 = vector.extract_strided_slice %417 {offsets = [0, 0], sizes = [1, 32], strides = [1, 1]} : vector<1x256xf32> to vector<1x32xf32>
    %419 = vector.extract_strided_slice %417 {offsets = [0, 128], sizes = [1, 32], strides = [1, 1]} : vector<1x256xf32> to vector<1x32xf32>
    %420 = vector.extract_strided_slice %408 {offsets = [0, 256], sizes = [1, 32], strides = [1, 1]} : vector<1x384xf32> to vector<1x32xf32>
    %421 = arith.addf %420, %321 : vector<1x32xf32>
    %422 = arith.mulf %418, %421 : vector<1x32xf32>
    %423 = arith.addf %336, %422 : vector<1x32xf32>
    %424 = math.tanh %423 : vector<1x32xf32>
    %cst_120 = arith.constant 1.000000e+00 : f32
    %425 = vector.broadcast %cst_120 : f32 to vector<1x32xf32>
    %426 = arith.subf %425, %419 : vector<1x32xf32>
    %427 = arith.mulf %426, %424 : vector<1x32xf32>
    %428 = arith.mulf %419, %407 : vector<1x32xf32>
    %429 = arith.addf %427, %428 : vector<1x32xf32>
    %cst_121 = arith.constant dense<0.000000e+00> : vector<1x384xf32>
    %430 = tpu.matmul %429, %319, %cst_121 {dimension_numbers = #tpu.dot_dimension_numbers<[1], [0], [0], [1], [0, 0, 1, 1], [], []>} : vector<1x32xf32>, vector<32x384xf32>, vector<1x384xf32> -> vector<1x384xf32>
    %431 = vector.extract_strided_slice %430 {offsets = [0, 0], sizes = [1, 256], strides = [1, 1]} : vector<1x384xf32> to vector<1x256xf32>
    %432 = arith.addf %329, %431 : vector<1x256xf32>
    %cst_122 = arith.constant 5.000000e-01 : f32
    %433 = vector.broadcast %cst_122 : f32 to vector<1x256xf32>
    %434 = arith.mulf %433, %432 : vector<1x256xf32>
    %435 = math.tanh %434 : vector<1x256xf32>
    %cst_123 = arith.constant 1.000000e+00 : f32
    %436 = vector.broadcast %cst_123 : f32 to vector<1x256xf32>
    %437 = arith.addf %435, %436 : vector<1x256xf32>
    %cst_124 = arith.constant 5.000000e-01 : f32
    %438 = vector.broadcast %cst_124 : f32 to vector<1x256xf32>
    %439 = arith.mulf %438, %437 : vector<1x256xf32>
    %440 = vector.extract_strided_slice %439 {offsets = [0, 0], sizes = [1, 32], strides = [1, 1]} : vector<1x256xf32> to vector<1x32xf32>
    %441 = vector.extract_strided_slice %439 {offsets = [0, 128], sizes = [1, 32], strides = [1, 1]} : vector<1x256xf32> to vector<1x32xf32>
    %442 = vector.extract_strided_slice %430 {offsets = [0, 256], sizes = [1, 32], strides = [1, 1]} : vector<1x384xf32> to vector<1x32xf32>
    %443 = arith.addf %442, %321 : vector<1x32xf32>
    %444 = arith.mulf %440, %443 : vector<1x32xf32>
    %445 = arith.addf %337, %444 : vector<1x32xf32>
    %446 = math.tanh %445 : vector<1x32xf32>
    %cst_125 = arith.constant 1.000000e+00 : f32
    %447 = vector.broadcast %cst_125 : f32 to vector<1x32xf32>
    %448 = arith.subf %447, %441 : vector<1x32xf32>
    %449 = arith.mulf %448, %446 : vector<1x32xf32>
    %450 = arith.mulf %441, %429 : vector<1x32xf32>
    %451 = arith.addf %449, %450 : vector<1x32xf32>
    %cst_126 = arith.constant dense<0.000000e+00> : vector<1x384xf32>
    %452 = tpu.matmul %451, %319, %cst_126 {dimension_numbers = #tpu.dot_dimension_numbers<[1], [0], [0], [1], [0, 0, 1, 1], [], []>} : vector<1x32xf32>, vector<32x384xf32>, vector<1x384xf32> -> vector<1x384xf32>
    %453 = vector.extract_strided_slice %452 {offsets = [0, 0], sizes = [1, 256], strides = [1, 1]} : vector<1x384xf32> to vector<1x256xf32>
    %454 = arith.addf %330, %453 : vector<1x256xf32>
    %cst_127 = arith.constant 5.000000e-01 : f32
    %455 = vector.broadcast %cst_127 : f32 to vector<1x256xf32>
    %456 = arith.mulf %455, %454 : vector<1x256xf32>
    %457 = math.tanh %456 : vector<1x256xf32>
    %cst_128 = arith.constant 1.000000e+00 : f32
    %458 = vector.broadcast %cst_128 : f32 to vector<1x256xf32>
    %459 = arith.addf %457, %458 : vector<1x256xf32>
    %cst_129 = arith.constant 5.000000e-01 : f32
    %460 = vector.broadcast %cst_129 : f32 to vector<1x256xf32>
    %461 = arith.mulf %460, %459 : vector<1x256xf32>
    %462 = vector.extract_strided_slice %461 {offsets = [0, 0], sizes = [1, 32], strides = [1, 1]} : vector<1x256xf32> to vector<1x32xf32>
    %463 = vector.extract_strided_slice %461 {offsets = [0, 128], sizes = [1, 32], strides = [1, 1]} : vector<1x256xf32> to vector<1x32xf32>
    %464 = vector.extract_strided_slice %452 {offsets = [0, 256], sizes = [1, 32], strides = [1, 1]} : vector<1x384xf32> to vector<1x32xf32>
    %465 = arith.addf %464, %321 : vector<1x32xf32>
    %466 = arith.mulf %462, %465 : vector<1x32xf32>
    %467 = arith.addf %338, %466 : vector<1x32xf32>
    %468 = math.tanh %467 : vector<1x32xf32>
    %cst_130 = arith.constant 1.000000e+00 : f32
    %469 = vector.broadcast %cst_130 : f32 to vector<1x32xf32>
    %470 = arith.subf %469, %463 : vector<1x32xf32>
    %471 = arith.mulf %470, %468 : vector<1x32xf32>
    %472 = arith.mulf %463, %451 : vector<1x32xf32>
    %473 = arith.addf %471, %472 : vector<1x32xf32>
    %cst_131 = arith.constant dense<0.000000e+00> : vector<1x384xf32>
    %474 = tpu.matmul %473, %319, %cst_131 {dimension_numbers = #tpu.dot_dimension_numbers<[1], [0], [0], [1], [0, 0, 1, 1], [], []>} : vector<1x32xf32>, vector<32x384xf32>, vector<1x384xf32> -> vector<1x384xf32>
    %475 = vector.extract_strided_slice %474 {offsets = [0, 0], sizes = [1, 256], strides = [1, 1]} : vector<1x384xf32> to vector<1x256xf32>
    %476 = arith.addf %331, %475 : vector<1x256xf32>
    %cst_132 = arith.constant 5.000000e-01 : f32
    %477 = vector.broadcast %cst_132 : f32 to vector<1x256xf32>
    %478 = arith.mulf %477, %476 : vector<1x256xf32>
    %479 = math.tanh %478 : vector<1x256xf32>
    %cst_133 = arith.constant 1.000000e+00 : f32
    %480 = vector.broadcast %cst_133 : f32 to vector<1x256xf32>
    %481 = arith.addf %479, %480 : vector<1x256xf32>
    %cst_134 = arith.constant 5.000000e-01 : f32
    %482 = vector.broadcast %cst_134 : f32 to vector<1x256xf32>
    %483 = arith.mulf %482, %481 : vector<1x256xf32>
    %484 = vector.extract_strided_slice %483 {offsets = [0, 0], sizes = [1, 32], strides = [1, 1]} : vector<1x256xf32> to vector<1x32xf32>
    %485 = vector.extract_strided_slice %483 {offsets = [0, 128], sizes = [1, 32], strides = [1, 1]} : vector<1x256xf32> to vector<1x32xf32>
    %486 = vector.extract_strided_slice %474 {offsets = [0, 256], sizes = [1, 32], strides = [1, 1]} : vector<1x384xf32> to vector<1x32xf32>
    %487 = arith.addf %486, %321 : vector<1x32xf32>
    %488 = arith.mulf %484, %487 : vector<1x32xf32>
    %489 = arith.addf %339, %488 : vector<1x32xf32>
    %490 = math.tanh %489 : vector<1x32xf32>
    %cst_135 = arith.constant 1.000000e+00 : f32
    %491 = vector.broadcast %cst_135 : f32 to vector<1x32xf32>
    %492 = arith.subf %491, %485 : vector<1x32xf32>
    %493 = arith.mulf %492, %490 : vector<1x32xf32>
    %494 = arith.mulf %485, %473 : vector<1x32xf32>
    %495 = arith.addf %493, %494 : vector<1x32xf32>
    %cst_136 = arith.constant dense<0.000000e+00> : vector<1x384xf32>
    %496 = tpu.matmul %495, %319, %cst_136 {dimension_numbers = #tpu.dot_dimension_numbers<[1], [0], [0], [1], [0, 0, 1, 1], [], []>} : vector<1x32xf32>, vector<32x384xf32>, vector<1x384xf32> -> vector<1x384xf32>
    %497 = vector.extract_strided_slice %496 {offsets = [0, 0], sizes = [1, 256], strides = [1, 1]} : vector<1x384xf32> to vector<1x256xf32>
    %498 = arith.addf %332, %497 : vector<1x256xf32>
    %cst_137 = arith.constant 5.000000e-01 : f32
    %499 = vector.broadcast %cst_137 : f32 to vector<1x256xf32>
    %500 = arith.mulf %499, %498 : vector<1x256xf32>
    %501 = math.tanh %500 : vector<1x256xf32>
    %cst_138 = arith.constant 1.000000e+00 : f32
    %502 = vector.broadcast %cst_138 : f32 to vector<1x256xf32>
    %503 = arith.addf %501, %502 : vector<1x256xf32>
    %cst_139 = arith.constant 5.000000e-01 : f32
    %504 = vector.broadcast %cst_139 : f32 to vector<1x256xf32>
    %505 = arith.mulf %504, %503 : vector<1x256xf32>
    %506 = vector.extract_strided_slice %505 {offsets = [0, 0], sizes = [1, 32], strides = [1, 1]} : vector<1x256xf32> to vector<1x32xf32>
    %507 = vector.extract_strided_slice %505 {offsets = [0, 128], sizes = [1, 32], strides = [1, 1]} : vector<1x256xf32> to vector<1x32xf32>
    %508 = vector.extract_strided_slice %496 {offsets = [0, 256], sizes = [1, 32], strides = [1, 1]} : vector<1x384xf32> to vector<1x32xf32>
    %509 = arith.addf %508, %321 : vector<1x32xf32>
    %510 = arith.mulf %506, %509 : vector<1x32xf32>
    %511 = arith.addf %340, %510 : vector<1x32xf32>
    %512 = math.tanh %511 : vector<1x32xf32>
    %cst_140 = arith.constant 1.000000e+00 : f32
    %513 = vector.broadcast %cst_140 : f32 to vector<1x32xf32>
    %514 = arith.subf %513, %507 : vector<1x32xf32>
    %515 = arith.mulf %514, %512 : vector<1x32xf32>
    %516 = arith.mulf %507, %495 : vector<1x32xf32>
    %517 = arith.addf %515, %516 : vector<1x32xf32>
    %518 = tpu.concatenate %363, %385, %407, %429, %451, %473, %495, %517 in 0 : vector<1x32xf32>, vector<1x32xf32>, vector<1x32xf32>, vector<1x32xf32>, vector<1x32xf32>, vector<1x32xf32>, vector<1x32xf32>, vector<1x32xf32> -> vector<8x32xf32>
    %c32_141 = arith.constant 32 : index
    %c0_142 = arith.constant 0 : index
    %519 = vector.load %arg4[%c32_141, %c0_142] : memref<104x128xf32, #tpu.memory_space<vmem>>, vector<32x32xf32>
    %cst_143 = arith.constant dense<0.000000e+00> : vector<8x32xf32>
    %520 = tpu.matmul %518, %519, %cst_143 {dimension_numbers = #tpu.dot_dimension_numbers<[1], [0], [0], [1], [0, 0, 1, 1], [], []>} : vector<8x32xf32>, vector<32x32xf32>, vector<8x32xf32> -> vector<8x32xf32>
    %521 = arith.addf %7, %520 : vector<8x32xf32>
    %c100 = arith.constant 100 : index
    %c0_144 = arith.constant 0 : index
    %522 = vector.load %arg4[%c100, %c0_144] : memref<104x128xf32, #tpu.memory_space<vmem>>, vector<1x32xf32>
    %523 = vector.broadcast %522 : vector<1x32xf32> to vector<8x32xf32>
    %524 = arith.addf %521, %523 : vector<8x32xf32>
    %cst_145 = arith.constant 5.000000e-01 : f32
    %525 = vector.broadcast %cst_145 : f32 to vector<8x32xf32>
    %526 = arith.mulf %525, %524 : vector<8x32xf32>
    %cst_146 = arith.constant 0.707106769 : f32
    %527 = vector.broadcast %cst_146 : f32 to vector<8x32xf32>
    %528 = arith.mulf %524, %527 : vector<8x32xf32>
    %cst_147 = arith.constant 0.000000e+00 : f32
    %529 = vector.broadcast %cst_147 : f32 to vector<8x32xf32>
    %530 = arith.cmpf olt, %528, %529 : vector<8x32xf32>
    %cst_148 = arith.constant -1.000000e+00 : f32
    %cst_149 = arith.constant 1.000000e+00 : f32
    %531 = vector.broadcast %cst_148 : f32 to vector<8x32xf32>
    %532 = vector.broadcast %cst_149 : f32 to vector<8x32xf32>
    %533 = arith.select %530, %531, %532 : vector<8x32xi1>, vector<8x32xf32>
    %534 = math.absf %528 : vector<8x32xf32>
    %cst_150 = arith.constant 0.327591091 : f32
    %535 = vector.broadcast %cst_150 : f32 to vector<8x32xf32>
    %536 = arith.mulf %535, %534 : vector<8x32xf32>
    %cst_151 = arith.constant 1.000000e+00 : f32
    %537 = vector.broadcast %cst_151 : f32 to vector<8x32xf32>
    %538 = arith.addf %537, %536 : vector<8x32xf32>
    %cst_152 = arith.constant 1.000000e+00 : f32
    %539 = vector.broadcast %cst_152 : f32 to vector<8x32xf32>
    %540 = arith.divf %539, %538 : vector<8x32xf32>
    %cst_153 = arith.constant 1.06140542 : f32
    %541 = vector.broadcast %cst_153 : f32 to vector<8x32xf32>
    %542 = arith.mulf %541, %540 : vector<8x32xf32>
    %cst_154 = arith.constant -1.45315206 : f32
    %543 = vector.broadcast %cst_154 : f32 to vector<8x32xf32>
    %544 = arith.addf %542, %543 : vector<8x32xf32>
    %545 = arith.mulf %544, %540 : vector<8x32xf32>
    %cst_155 = arith.constant 1.42141378 : f32
    %546 = vector.broadcast %cst_155 : f32 to vector<8x32xf32>
    %547 = arith.addf %545, %546 : vector<8x32xf32>
    %548 = arith.mulf %547, %540 : vector<8x32xf32>
    %cst_156 = arith.constant -0.284496725 : f32
    %549 = vector.broadcast %cst_156 : f32 to vector<8x32xf32>
    %550 = arith.addf %548, %549 : vector<8x32xf32>
    %551 = arith.mulf %550, %540 : vector<8x32xf32>
    %cst_157 = arith.constant 0.254829586 : f32
    %552 = vector.broadcast %cst_157 : f32 to vector<8x32xf32>
    %553 = arith.addf %551, %552 : vector<8x32xf32>
    %554 = arith.mulf %553, %540 : vector<8x32xf32>
    %cst_158 = arith.constant 0.000000e+00 : f32
    %555 = vector.broadcast %cst_158 : f32 to vector<8x32xf32>
    %556 = arith.subf %555, %534 : vector<8x32xf32>
    %557 = arith.mulf %556, %534 : vector<8x32xf32>
    %558 = math.exp %557 : vector<8x32xf32>
    %559 = arith.mulf %554, %558 : vector<8x32xf32>
    %cst_159 = arith.constant 1.000000e+00 : f32
    %560 = vector.broadcast %cst_159 : f32 to vector<8x32xf32>
    %561 = arith.subf %560, %559 : vector<8x32xf32>
    %562 = arith.mulf %533, %561 : vector<8x32xf32>
    %cst_160 = arith.constant 1.000000e+00 : f32
    %563 = vector.broadcast %cst_160 : f32 to vector<8x32xf32>
    %564 = arith.addf %563, %562 : vector<8x32xf32>
    %565 = arith.mulf %526, %564 : vector<8x32xf32>
    %c101 = arith.constant 101 : index
    %c0_161 = arith.constant 0 : index
    %566 = vector.load %arg4[%c101, %c0_161] : memref<104x128xf32, #tpu.memory_space<vmem>>, vector<1x32xf32>
    %c102 = arith.constant 102 : index
    %c0_162 = arith.constant 0 : index
    %567 = vector.load %arg4[%c102, %c0_162] : memref<104x128xf32, #tpu.memory_space<vmem>>, vector<1x32xf32>
    %cst_163 = arith.constant dense<0.000000e+00> : vector<8xf32>
    %568 = vector.multi_reduction <add>, %565, %cst_163 [1] : vector<8x32xf32> to vector<8xf32>
    %569 = vector.shape_cast %568 : vector<8xf32> to vector<8x1xf32>
    %cst_164 = arith.constant 3.200000e+01 : f32
    %570 = vector.broadcast %cst_164 : f32 to vector<8x1xf32>
    %571 = arith.divf %569, %570 : vector<8x1xf32>
    %572 = vector.broadcast %571 : vector<8x1xf32> to vector<8x32xf32>
    %573 = arith.subf %565, %572 : vector<8x32xf32>
    %574 = arith.mulf %573, %573 : vector<8x32xf32>
    %cst_165 = arith.constant dense<0.000000e+00> : vector<8xf32>
    %575 = vector.multi_reduction <add>, %574, %cst_165 [1] : vector<8x32xf32> to vector<8xf32>
    %576 = vector.shape_cast %575 : vector<8xf32> to vector<8x1xf32>
    %cst_166 = arith.constant 3.200000e+01 : f32
    %577 = vector.broadcast %cst_166 : f32 to vector<8x1xf32>
    %578 = arith.divf %576, %577 : vector<8x1xf32>
    %cst_167 = arith.constant 9.99999974E-6 : f32
    %579 = vector.broadcast %cst_167 : f32 to vector<8x1xf32>
    %580 = arith.addf %578, %579 : vector<8x1xf32>
    %581 = math.rsqrt %580 : vector<8x1xf32>
    %582 = vector.broadcast %581 : vector<8x1xf32> to vector<8x32xf32>
    %583 = arith.mulf %573, %582 : vector<8x32xf32>
    %584 = vector.broadcast %566 : vector<1x32xf32> to vector<8x32xf32>
    %585 = arith.mulf %583, %584 : vector<8x32xf32>
    %586 = vector.broadcast %567 : vector<1x32xf32> to vector<8x32xf32>
    %587 = arith.addf %585, %586 : vector<8x32xf32>
    %c64_168 = arith.constant 64 : index
    %c0_169 = arith.constant 0 : index
    %588 = vector.load %arg4[%c64_168, %c0_169] : memref<104x128xf32, #tpu.memory_space<vmem>>, vector<32x8xf32>
    %cst_170 = arith.constant dense<0.000000e+00> : vector<8x8xf32>
    %589 = tpu.matmul %587, %588, %cst_170 {dimension_numbers = #tpu.dot_dimension_numbers<[1], [0], [0], [1], [0, 0, 1, 1], [], []>} : vector<8x32xf32>, vector<32x8xf32>, vector<8x8xf32> -> vector<8x8xf32>
    %c103 = arith.constant 103 : index
    %c0_171 = arith.constant 0 : index
    %590 = vector.load %arg4[%c103, %c0_171] : memref<104x128xf32, #tpu.memory_space<vmem>>, vector<1x8xf32>
    %591 = vector.broadcast %590 : vector<1x8xf32> to vector<8x8xf32>
    %592 = arith.addf %589, %591 : vector<8x8xf32>
    %cst_172 = arith.constant 5.000000e-01 : f32
    %593 = vector.broadcast %cst_172 : f32 to vector<8x8xf32>
    %594 = arith.mulf %593, %592 : vector<8x8xf32>
    %595 = math.tanh %594 : vector<8x8xf32>
    %cst_173 = arith.constant 1.000000e+00 : f32
    %596 = vector.broadcast %cst_173 : f32 to vector<8x8xf32>
    %597 = arith.addf %595, %596 : vector<8x8xf32>
    %cst_174 = arith.constant 5.000000e-01 : f32
    %598 = vector.broadcast %cst_174 : f32 to vector<8x8xf32>
    %599 = arith.mulf %598, %597 : vector<8x8xf32>
    %c0_175 = arith.constant 0 : index
    %c0_176 = arith.constant 0 : index
    %600 = vector.load %arg5[%c0_175, %c0_176] : memref<8x8xf32, #tpu.memory_space<vmem>>, vector<8x8xf32>
    tpu.vector_store %arg5[%c0_175, %c0_176], %599 {strides = array<i32>} : memref<8x8xf32, #tpu.memory_space<vmem>>, vector<8x8xf32>,
    return
  }
}

</mosaic_0001>

<bundles_post_ra>
// kernel: tpu_custom_call.1
= control target key start
LH: loop header
LB: loop body
LE: loop exit
PB: predicated region body
PF: predicated region fallthrough
CT: control target
= control target key end

     0   :  { %10 = vsyncpa [#allocation3], 0  ;;  %s5114_s0 = inlined_call_operand.hbm [shape: f32[8,24], index: 0, kind: input, shape index: {}]   ;;  %s5115_s1 = inlined_call_operand.vmem [shape: f32[2,32], index: 1, kind: input, shape index: {}]   ;;  %s5116_s2 = inlined_call_operand.hbm [shape: f32[24,256], index: 2, kind: input, shape index: {}]   ;;  %s5117_s3 = inlined_call_operand.hbm [shape: f32[144,384], index: 3, kind: input, shape index: {}]   ;;  %s5118_s4 = inlined_call_operand.hbm [shape: f32[104,128], index: 4, kind: input, shape index: {}]   ;;  %s5119_s5 = inlined_call_operand.hbm [shape: f32[8,8], index: 5, kind: output, shape index: {}]  }
   0x1   :  { %11 = vsyncpa [#allocation6], 0 }
   0x2   :  { %12 = vsyncpa [#allocation9], 0 }
   0x3   :  { %13 = vsyncpa [#allocation4], 0  ;;  %s4608_s18 = smov [#allocation5]   ;;  %s4490_s22 = scalar_lea.hbm %s5116_s2, 768 }
   0x4   :  { %s31_s19 = sshll.u32 %s4608_s18, 4  ;;  %p4491_p0 = scmp.ne.s32.totalorder %s5116_s2, %s4490_s22  ;;  %s32_s19 = int_to_ptr.vmem [resolvable:$true] %s31_s19 }
   0x5   :  { %p4494_p1 = scmp.lt.u32.totalorder %s4490_s22, %s5116_s2 }
   0x7   :  { %p4496_p2 = pnand %p4494_p1, %p4491_p0 }
   0x9   :  { %4499 = shalt.err (!%p4496_p2)
}
   0xa   :  { %s4500_s27 = scalar_lea.vmem %s32_s19, 768  ;;  %p4505_p4 = scmp.lt.s32.totalorder %s32_s19, %s32_s19 }
   0xb   :  { %p4501_p3 = scmp.ne.s32.totalorder %s32_s19, %s4500_s27  ;;  %p4506_p5 = scmp.lt.s32.totalorder %s4500_s27, %s4500_s27 }
   0xd   :  { %p4507_p6 = por %p4506_p5, %p4505_p4 }
   0xf   :  { %p4508_p7 = pnand %p4507_p6, %p4501_p3 }
  0x11   :  { %4511 = shalt.err (!%p4508_p7)
}
  0x12   :  { %s4609_s28 = smov 256   ;;  %s4610_s29 = smov 16  }
  0x13   :  { %37 = dma.hbm_to_vmem [thread:$0]  %s5116_s2, 768, %s32_s19, [#allocation6], %s4609_s28, %s4609_s28, %s4610_s29  }
  0x14   :  { %s4611_s7 = smov [#allocation2]   ;;  %s4612_s9 = smov [#allocation7]  }
  0x15   :  { %s20_s8 = sshll.u32 %s4611_s7, 4  ;;  %s43_s10 = sshll.u32 %s4612_s9, 4  ;;  %s21_s8 = int_to_ptr.vmem [resolvable:$true] %s20_s8  ;;  %s44_s10 = int_to_ptr.vmem [resolvable:$true] %s43_s10 }
  0x16   :  { %s4512_s13 = scalar_lea.hbm %s5114_s0, 128 }
  0x17   :  { %p4513_p8 = scmp.ne.s32.totalorder %s5114_s0, %s4512_s13  ;;  %p4516_p9 = scmp.lt.u32.totalorder %s4512_s13, %s5114_s0 }
  0x19   :  { %p4518_p10 = pnand %p4516_p9, %p4513_p8 }
  0x1b   :  { %4521 = shalt.err (!%p4518_p10)
}
  0x1c   :  { %s4522_s2 = scalar_lea.vmem %s21_s8, 128  ;;  %p4527_p12 = scmp.lt.s32.totalorder %s21_s8, %s21_s8 }
  0x1d   :  { %p4523_p11 = scmp.ne.s32.totalorder %s21_s8, %s4522_s2  ;;  %p4528_p13 = scmp.lt.s32.totalorder %s4522_s2, %s4522_s2 }
  0x1f   :  { %p4529_p0 = por %p4528_p13, %p4527_p12 }
  0x21   :  { %p4530_p1 = pnand %p4529_p0, %p4523_p11 }
  0x23   :  { %4533 = shalt.err (!%p4530_p1)
}
  0x24   :  { %23 = dma.hbm_to_vmem [thread:$0]  %s5114_s0, 128, %s21_s8, [#allocation3]  }
  0x25   :  { %s4534_s22 = scalar_lea.hbm %s5117_s3, 6912 }
  0x26   :  { %p4535_p2 = scmp.ne.s32.totalorder %s5117_s3, %s4534_s22  ;;  %p4538_p3 = scmp.lt.u32.totalorder %s4534_s22, %s5117_s3 }
  0x28   :  { %p4540_p4 = pnand %p4538_p3, %p4535_p2 }
  0x2a   :  { %4543 = shalt.err (!%p4540_p4)
}
  0x2b   :  { %s4544_s27 = scalar_lea.vmem %s44_s10, 6912  ;;  %p4549_p6 = scmp.lt.s32.totalorder %s44_s10, %s44_s10 }
  0x2c   :  { %p4545_p5 = scmp.ne.s32.totalorder %s44_s10, %s4544_s27  ;;  %p4550_p7 = scmp.lt.s32.totalorder %s4544_s27, %s4544_s27 }
  0x2e   :  { %p4551_p8 = por %p4550_p7, %p4549_p6 }
  0x30   :  { %p4552_p9 = pnand %p4551_p8, %p4545_p5 }
  0x32   :  { %4555 = shalt.err (!%p4552_p9)
}
  0x33   :  { %s4613_s0 = smov 384   ;;  %s4614_s28 = smov 24  }
  0x34   :  { %49 = dma.hbm_to_vmem [thread:$0]  %s5117_s3, 6912, %s44_s10, [#allocation6], %s4613_s0, %s4613_s0, %s4614_s28  }
  0x35   :  { %s4615_s6 = smov [#allocation8]   ;;  %s4556_s11 = scalar_lea.hbm %s5118_s4, 1664 }
  0x36   :  { %s55_s7 = sshll.u32 %s4615_s6, 4  ;;  %p4557_p10 = scmp.ne.s32.totalorder %s5118_s4, %s4556_s11  ;;  %s56_s7 = int_to_ptr.vmem [resolvable:$true] %s55_s7 }
  0x37   :  { %p4560_p11 = scmp.lt.u32.totalorder %s4556_s11, %s5118_s4 }
  0x39   :  { %p4562_p12 = pnand %p4560_p11, %p4557_p10 }
  0x3b   :  { %4565 = shalt.err (!%p4562_p12)
}
  0x3c   :  { %s4566_s16 = scalar_lea.vmem %s56_s7, 1664  ;;  %p4571_p0 = scmp.lt.s32.totalorder %s56_s7, %s56_s7 }
  0x3d   :  { %p4567_p13 = scmp.ne.s32.totalorder %s56_s7, %s4566_s16  ;;  %p4572_p1 = scmp.lt.s32.totalorder %s4566_s16, %s4566_s16 }
  0x3f   :  { %p4573_p2 = por %p4572_p1, %p4571_p0 }
  0x41   :  { %p4574_p3 = pnand %p4573_p2, %p4567_p13 }
  0x43   :  { %4577 = shalt.err (!%p4574_p3)
}
  0x44   :  { %s4616_s3 = smov 128   ;;  %s4617_s10 = smov 8  }
  0x45   :  { %61 = dma.hbm_to_vmem [thread:$0]  %s5118_s4, 1664, %s56_s7, [#allocation9], %s4616_s3, %s4616_s3, %s4617_s10  }
  0x46   :  { %4600 = dma.done.wait [#allocation3], 128  }
  0x47   :  { %4601 = vsyncadd [#allocation3], 4294967168 }
  0x48   :  { %4602 = dma.done.wait [#allocation6], 7680  }
  0x49   :  { %4603 = vsyncadd [#allocation6], 4294959616 }
  0x4a   :  { %4604 = dma.done.wait [#allocation9], 1664  }
  0x4b   :  { %4605 = vsyncadd [#allocation9], 4294965632  ;;  %v4618_v0 = vmov 0.0   ;;  %v76_v1 = vld [vmem:[#allocation5 + $0x8] sm:$0xff]  ;;  %v78_v2 = vld [vmem:[#allocation5 + $0x18] sm:$0xff]  ;;  %vm81_vm0 = vcmask 195584  }
  0x4c   :  { %149 = vmatprep.mubr.f32.mxu0 %v4618_v0  ;;  %v75_v3 = vld [vmem:[#allocation5] sm:$0xff]  ;;  %v4094_v4 = vpack.c.bf16 %v78_v2, %v76_v1  ;;  %v77_v5 = vld [vmem:[#allocation5 + $0x10] sm:$0xff]  ;;  %v80_v7 = vld [vmem:[#allocation5 + $0x28] sm:$0xff]  ;;  %v4619_v34 = vmov 1.0   ;;  %vm191_vm2 = vcmask 261120   ;;  %v4620_v49 = vmov 0.0|0.0  }
  0x4d   :  { %v4096_v6 = vpack.c.bf16 %v77_v5, %v75_v3  ;;  %v79_v8 = vld [vmem:[#allocation5 + $0x20] sm:$0xff]  ;;  %v74_v9 = vld [vmem:[#allocation2] sm:$0xff]  ;;  %v217_v47 = vld [vmem:[#allocation8 + $0x8] sm:$0xff]  ;;  %4098 = vmatprep.subr.bf16.mxu1 %v4620_v49  ;;  %vm4621_vm3 = vmmov 0   ;;  %vm362_vm5 = vcmask 130048   ;;  %vm1887_vm6 = vcmask 1040384  }
  0x4e   :  { %4095 = vmatprep.subr.bf16.mxu0 %v4094_v4  ;;  %v3717_v10 = vld [vmem:[#allocation8 + $0x60] ss:$0 sm:$0xff]  ;;  %v218_v48 = vld [vmem:[#allocation8 + $0x10] sm:$0xff]  ;;  %v219_v51 = vld [vmem:[#allocation8 + $0x18] sm:$0xff]  ;;  %3875 = vmatprep.mubr.msk.f32.mxu1 %vm4621_vm3, %v4618_v0  ;;  %vm1889_vm7 = vcmask 1041408   ;;  %vm1891_vm8 = vcmask 1042432  }
  0x4f   :  { %4097 = vmatpush1.bf16.msra.mxu0 %v4096_v6  ;;  %v216_v46 = vld [vmem:[#allocation8] sm:$0xff]  ;;  %v4102_v52 = vpack.c.bf16 %v219_v51, %v218_v48  ;;  %v326_v62 = vld [vmem:[#allocation7 + $0x8] sm:$0xff]  ;;  %v329_v63 = vld [vmem:[#allocation7 + $0x20] sm:$0xff]  ;;  %vm1893_vm9 = vcmask 1043456   ;;  %vm1895_vm10 = vcmask 1044480   ;;  %vm1897_vm11 = vcmask 1045504  }
  0x50   :  { %89 = vmatprep.subr.mxu0 %v80_v7  ;;  %v4099_v50 = vpack.c.bf16 %v217_v47, %v216_v46  ;;  %v3718_v57 = vld [vmem:[#allocation8 + $0x61] ss:$0 sm:$0xff]  ;;  %v3719_v59 = vld [vmem:[#allocation8 + $0x62] ss:$0 sm:$0xff]  ;;  %v4104_v1 = vpack.c.bf16 %v329_v63, %v326_v62  ;;  %v325_v2 = vld [vmem:[#allocation7] sm:$0xff]  ;;  %vm1899_vm12 = vcmask 1046528  }
  0x51   :  { %v328_v3 = vld [vmem:[#allocation7 + $0x18] sm:$0xff]  ;;  %v327_v5 = vld [vmem:[#allocation7 + $0x10] sm:$0xff]  ;;  %v330_v6 = vld [vmem:[#allocation7 + $0x28] sm:$0xff]  ;;  %vm3697_vm14 = vcmask 64512  }
  0x52   :  { %4100 = vmatpush3.bf16.msra.mxu1 %v4099_v50  ;;  %v4106_v4 = vpack.c.bf16 %v328_v3, %v325_v2  ;;  %v4109_v7 = vpack.c.bf16 %v330_v6, %v327_v5  ;;  %v337_v51 = vld [vmem:[#allocation7 + $0x90] sm:$0xff] }
  0x53   :  { %90 = vmatpush1.msra.mxu0 %v79_v8  ;;  %4101 = vmatprep.subr.bf16.mxu1 %v4620_v49  ;;  %v332_v8 = vld [vmem:[#allocation7 + $0x68] sm:$0xff] }
  0x54   :  { %3716 = vmatmul.mubr.msk.f32.vlgmr.msra.gmra.mrb[0].mxu0 %vm81_vm0, %v74_v9  ;;  %4105 = vmatprep.subr.bf16.mxu0 %v4104_v1  ;;  %v335_v9 = vld [vmem:[#allocation7 + $0x80] sm:$0xff] }
  0x55   :  { %430 = vmatprep.mubr.f32.mxu0 %v4618_v0  ;;  %4107 = vmatpush1.bf16.msra.mxu0 %v4106_v4  ;;  %v344_v62 = vld [vmem:[#allocation7 + $0xc0] ss:$8 sm:$0x7] }
  0x56   :  { %4103 = vmatpush3.bf16.msra.mxu1 %v4102_v52  ;;  %v340_v52 = vld [vmem:[#allocation7 + $0xa8] sm:$0xff] }
  0x57   :  { %4108 = vmatprep.subr.bf16.mxu1 %v4620_v49 }
 0x127   :  { %v151_v11 = vpop.f32.mrb[0].mxu0 }
 0x128   :  { %v161_v12 = vadd.f32 %v3717_v10, %v151_v11  ;;  %v4703_v13 = vpop.f32.mrb[1].mxu0  ;;  %v4716_v10 = vpack.c.bf16 %v335_v9, %v332_v8  ;;  %v3720_v11 = vld [vmem:[#allocation8 + $0x63] ss:$0 sm:$0xff] }
 0x12a   :  { %v163_v14 = vmul.f32 0.70710677, %v161_v12  ;;  %v162_v37 = vmul.f32 0.5, %v161_v12  ;;  %4112 = vmatprep.subr.bf16.mxu0 %v4716_v10 }
 0x12c   :  { %v166_v15 = vand.u32 2147483647, %v163_v14  ;;  %vm164_vm1 = vcmp.lt.f32.partialorder %v163_v14, 0.0 }
 0x12d   :  { %v165_v35 = vsel %vm164_vm1, -1.0, %v4619_v34 }
 0x12e   :  { %v167_v16 = vmul.f32 0.3275911, %v166_v15  ;;  %v180_v18 = vsub.f32 0.0, %v166_v15 }
 0x130   :  { %v168_v17 = vadd.f32 1.0, %v167_v16  ;;  %v181_v20 = vmul.f32 %v180_v18, %v166_v15 }
 0x132   :  { %4376 = vrcp.f32 %v168_v17  ;;  %v182_v23 = vmul.f32 1.442695, %v181_v20 }
 0x134   :  { %4378 = vpow2.f32 %v182_v23 }
 0x13c   :  { %v4377_v19 = vpop.eup %4376 }
 0x13d   :  { %v171_v21 = vmul.f32 1.0614054, %v4377_v19 }
 0x13e   :  { %v4379_v31 = vpop.eup %4378 }
 0x13f   :  { %v172_v22 = vadd.f32 -1.4531521, %v171_v21 }
 0x141   :  { %v173_v24 = vmul.f32 %v4377_v19, %v172_v22 }
 0x143   :  { %v174_v25 = vadd.f32 1.4214138, %v173_v24 }
 0x145   :  { %v175_v26 = vmul.f32 %v4377_v19, %v174_v25 }
 0x147   :  { %v176_v27 = vadd.f32 -0.28449672, %v175_v26 }
 0x149   :  { %v177_v28 = vmul.f32 %v4377_v19, %v176_v27 }
 0x14b   :  { %v178_v29 = vadd.f32 0.2548296, %v177_v28 }
 0x14d   :  { %v179_v30 = vmul.f32 %v4377_v19, %v178_v29 }
 0x14f   :  { %v184_v32 = vmul.f32 %v4379_v31, %v179_v30 }
 0x151   :  { %v185_v33 = vsub.f32 1.0, %v184_v32 }
 0x153   :  { %v186_v36 = vmul.f32 %v185_v33, %v165_v35 }
 0x155   :  { %v187_v38 = vadd.f32 1.0, %v186_v36 }
 0x157   :  { %v188_v39 = vmul.f32 %v187_v38, %v162_v37 }
 0x159   :  { %v192_v40 = vsel %vm191_vm2, %v188_v39, 0.0 }
 0x15a   :  { %193 = vadd.xlane.f32.xlu0 %v192_v40  ;;  %v334_v40 = vld [vmem:[#allocation7 + $0x78] sm:$0xff] }
 0x1e7   :  { %v194_v41 = vpop.xlane.xlu0 %193 }
 0x1e8   :  { %v196_v42 = vmul.f32 0.03125, %v194_v41  ;;  %v338_v41 = vld [vmem:[#allocation7 + $0x98] sm:$0xff] }
 0x1ea   :  { %v197_v43 = vsub.f32 %v188_v39, %v196_v42  ;;  %v331_v39 = vld [vmem:[#allocation7 + $0x60] sm:$0xff]  ;;  %v341_v42 = vld [vmem:[#allocation7 + $0xb0] sm:$0xff] }
 0x1eb   :  { %v4721_v47 = vpack.c.bf16 %v334_v40, %v331_v39  ;;  %v4723_v50 = vpack.c.bf16 %v341_v42, %v338_v41 }
 0x1ec   :  { %v198_v44 = vmul.f32 %v197_v43, %v197_v43 }
 0x1ee   :  { %v199_v45 = vsel %vm191_vm2, %v198_v44, 0.0  ;;  %v336_v44 = vld [vmem:[#allocation7 + $0x88] sm:$0xff] }
 0x1ef   :  { %200 = vadd.xlane.f32.xlu0 %v199_v45 }
 0x27c   :  { %v201_v53 = vpop.xlane.xlu0 %200 }
 0x27d   :  { %v202_v54 = vmul.f32 0.03125, %v201_v53 }
 0x27f   :  { %v203_v55 = vadd.f32 1e-05, %v202_v54  ;;  %v339_v54 = vld [vmem:[#allocation7 + $0xa0] sm:$0xff] }
 0x281   :  { %4380 = vrsqrt.f32 %v203_v55  ;;  %v342_v55 = vld [vmem:[#allocation7 + $0xb8] sm:$0xff] }
 0x28b   :  { %v4381_v56 = vpop.eup %4380 }
 0x28c   :  { %v205_v58 = vmul.f32 %v4381_v56, %v197_v43  ;;  %v333_v43 = vld [vmem:[#allocation7 + $0x70] sm:$0xff]  ;;  %v4728_v56 = vpack.c.bf16 %v340_v52, %v337_v51 }
 0x28d   :  { %v4725_v53 = vpack.c.bf16 %v336_v44, %v333_v43 }
 0x28e   :  { %v210_v60 = vmul.f32 %v3718_v57, %v205_v58  ;;  %v4733_v57 = vpack.c.bf16 %v342_v55, %v339_v54  ;;  %v507_v58 = vld [vmem:[%s5115_s1] sm:$0x1] }
 0x290   :  { %v215_v61 = vadd.f32 %v3719_v59, %v210_v60  ;;  %v347_v59 = vlaneseq }
 0x292   :  { %3876 = vmatmul.mubr.msk.f32.vlgmr.msra.gmra.mrb[0].mxu1 %vm191_vm2, %v215_v61  ;;  %v4758_v60 = vshrl.u32 %v347_v59, 7 }
 0x293   :  { %3882 = vmatprep.mubr.msk.f32.mxu1 %vm4621_vm3, %v4618_v0  ;;  %4110 = vmatpush3.bf16.msra.mxu1 %v4109_v7 }
 0x294   :  { %4119 = vmatprep.subr.bf16.mxu1 %v4620_v49  ;;  %v349_v61 = vsub.s32 0, %v4758_v60  ;;  %v353_v4 = vsub.s32 1, %v4758_v60 }
 0x296   :  { %v350_v5 = vrot.slane %v344_v62, %v349_v61  ;;  %v354_v6 = vrot.slane %v344_v62, %v353_v4 }
 0x365   :  { %v294_v12 = vpop.f32.mrb[0].mxu1 }
 0x366   :  { %v295_v14 = vadd.f32 %v3720_v11, %v294_v12  ;;  %v3877_v15 = vpop.f32.mrb[1].mxu1 }
 0x368   :  { %v299_v16 = vmul.f32 0.70710677, %v295_v14  ;;  %v298_v45 = vmul.f32 0.5, %v295_v14 }
 0x36a   :  { %v302_v17 = vand.u32 2147483647, %v299_v16  ;;  %vm300_vm4 = vcmp.lt.f32.partialorder %v299_v16, 0.0 }
 0x36b   :  { %v301_v37 = vsel %vm300_vm4, -1.0, %v4619_v34 }
 0x36c   :  { %v303_v18 = vmul.f32 0.3275911, %v302_v17  ;;  %v316_v20 = vsub.f32 0.0, %v302_v17 }
 0x36e   :  { %v304_v19 = vadd.f32 1.0, %v303_v18  ;;  %v317_v22 = vmul.f32 %v316_v20, %v302_v17  ;;  %v4773_v20 = vld [vmem:[#allocation7 + $0xc1] ss:$0 sm:$0xff] }
 0x370   :  { %4382 = vrcp.f32 %v304_v19  ;;  %v318_v25 = vmul.f32 1.442695, %v317_v22  ;;  %v357_v19 = vsub.s32 2, %v4758_v60 }
 0x372   :  { %4384 = vpow2.f32 %v318_v25  ;;  %v358_v22 = vrot.slane %v344_v62, %v357_v19 }
 0x37a   :  { %v4383_v21 = vpop.eup %4382 }
 0x37b   :  { %v307_v23 = vmul.f32 1.0614054, %v4383_v21 }
 0x37c   :  { %v4385_v33 = vpop.eup %4384 }
 0x37d   :  { %v308_v24 = vadd.f32 -1.4531521, %v307_v23 }
 0x37f   :  { %v309_v26 = vmul.f32 %v4383_v21, %v308_v24 }
 0x381   :  { %v310_v27 = vadd.f32 1.4214138, %v309_v26 }
 0x383   :  { %v311_v28 = vmul.f32 %v4383_v21, %v310_v27 }
 0x385   :  { %v312_v29 = vadd.f32 -0.28449672, %v311_v28 }
 0x387   :  { %v313_v30 = vmul.f32 %v4383_v21, %v312_v29 }
 0x389   :  { %v314_v31 = vadd.f32 0.2548296, %v313_v30 }
 0x38b   :  { %v315_v32 = vmul.f32 %v4383_v21, %v314_v31 }
 0x38d   :  { %v320_v35 = vmul.f32 %v4385_v33, %v315_v32 }
 0x38f   :  { %v321_v36 = vsub.f32 1.0, %v320_v35 }
 0x391   :  { %v322_v38 = vmul.f32 %v321_v36, %v301_v37 }
 0x393   :  { %v323_v46 = vadd.f32 1.0, %v322_v38 }
 0x395   :  { %v324_v48 = vmul.f32 %v323_v46, %v298_v45 }
 0x397   :  { %3722 = vmatmul.mubr.msk.f32.vlgmr.msra.gmra.mrb[2].mxu0 %vm362_vm5, %v324_v48  ;;  %3883 = vmatmul.mubr.msk.f32.vlgmr.msra.gmra.mrb[2].mxu1 %vm362_vm5, %v324_v48 }
 0x398   :  { %4114 = vmatpush1.bf16.msra.mxu0 %v4721_v47  ;;  %575 = vmatprep.mubr.f32.mxu0 %v4618_v0 }
 0x399   :  { %4116 = vmatprep.subr.bf16.mxu0 %v4723_v50  ;;  %4121 = vmatpush3.bf16.msra.mxu1 %v4725_v53 }
 0x39a   :  { %4122 = vmatprep.subr.bf16.mxu1 %v4620_v49  ;;  %3893 = vmatprep.mubr.msk.f32.mxu1 %vm4621_vm3, %v4618_v0 }
 0x39c   :  { %4118 = vmatpush1.bf16.msra.mxu0 %v4728_v56 }
 0x39d   :  { %4124 = vmatpush3.bf16.msra.mxu1 %v4733_v57  ;;  %4126 = vmatprep.subr.bf16.mxu0 %v4716_v10 }
 0x39e   :  { %4133 = vmatprep.subr.bf16.mxu1 %v4620_v49 }
 0x39f   :  { %3724 = vmatmul.mubr.msk.f32.vlgmr.msra.gmra.mrb[4].mxu0 %vm191_vm2, %v507_v58 }
 0x3a0   :  { %3894 = vmatmul.mubr.msk.f32.vlgmr.msra.gmra.mrb[4].mxu1 %vm191_vm2, %v507_v58  ;;  %4128 = vmatpush1.bf16.msra.mxu0 %v4721_v47 }
 0x3a1   :  { %4135 = vmatpush3.bf16.msra.mxu1 %v4725_v53  ;;  %4130 = vmatprep.subr.bf16.mxu0 %v4723_v50 }
 0x3a2   :  { %4136 = vmatprep.subr.bf16.mxu1 %v4620_v49  ;;  %737 = vmatprep.mubr.f32.mxu0 %v4618_v0 }
 0x3a3   :  { %3904 = vmatprep.mubr.msk.f32.mxu1 %vm4621_vm3, %v4618_v0 }
 0x3a4   :  { %4132 = vmatpush1.bf16.msra.mxu0 %v4728_v56 }
 0x3a5   :  { %4138 = vmatpush3.bf16.msra.mxu1 %v4733_v57  ;;  %4140 = vmatprep.subr.bf16.mxu0 %v4716_v10 }
 0x3a6   :  { %4147 = vmatprep.subr.bf16.mxu1 %v4620_v49 }
 0x46a   :  { %v432_v63 = vpop.f32.mrb[2].mxu0  ;;  %v503_v1 = vpop.f32.mrb[2].mxu1 }
 0x46b   :  { %v434_v2 = vpop.f32.mrb[3].mxu0  ;;  %v3884_v3 = vpop.f32.mrb[3].mxu1  ;;  %v4766_v7 = vadd.f32 %v432_v63, %v350_v5  ;;  %v4778_v26 = vadd.f32 %v503_v1, %v358_v22 }
 0x46c   :  { %v4769_v14 = vadd.f32 %v434_v2, %v354_v6 }
 0x472   :  { %v577_v8 = vpop.f32.mrb[4].mxu0 }
 0x473   :  { %v652_v9 = vadd.f32 %v577_v8, %v4766_v7  ;;  %v579_v11 = vpop.f32.mrb[5].mxu0  ;;  %v648_v12 = vpop.f32.mrb[4].mxu1 }
 0x474   :  { %v3895_v15 = vpop.f32.mrb[5].mxu1  ;;  %v653_v17 = vadd.f32 %v579_v11, %v4769_v14  ;;  %v662_v24 = vadd.f32 %v648_v12, %v4773_v20 }
 0x475   :  { %v654_v16 = vmul.f32 0.5, %v652_v9 }
 0x476   :  { %v655_v18 = vmul.f32 0.5, %v653_v17 }
 0x477   :  { %4386 = vtanh.f32 %v654_v16 }
 0x478   :  { %4388 = vtanh.f32 %v655_v18 }
 0x481   :  { %v4387_v21 = vpop.eup %4386 }
 0x482   :  { %v658_v23 = vadd.f32 1.0, %v4387_v21  ;;  %v4389_v28 = vpop.eup %4388 }
 0x483   :  { %v659_v30 = vadd.f32 1.0, %v4389_v28 }
 0x484   :  { %v660_v25 = vmul.f32 0.5, %v658_v23 }
 0x485   :  { %v661_v31 = vmul.f32 0.5, %v659_v30 }
 0x486   :  { %v663_v27 = vmul.f32 %v662_v24, %v660_v25 }
 0x487   :  { %v666_v32 = vsub.f32 1.0, %v661_v31  ;;  %v668_v35 = vmul.f32 %v661_v31, %v507_v58 }
 0x488   :  { %v664_v29 = vadd.f32 %v663_v27, %v4778_v26 }
 0x48a   :  { %4390 = vtanh.f32 %v664_v29 }
 0x494   :  { %v4391_v33 = vpop.eup %4390 }
 0x495   :  { %v667_v36 = vmul.f32 %v4391_v33, %v666_v32 }
 0x497   :  { %v4781_v37 = vadd.f32 %v668_v35, %v667_v36 }
 0x499   :  { %3726 = vmatmul.mubr.msk.f32.vlgmr.msra.gmra.mrb[6].mxu0 %vm191_vm2, %v4781_v37  ;;  %3905 = vmatmul.mubr.msk.f32.vlgmr.msra.gmra.mrb[6].mxu1 %vm191_vm2, %v4781_v37  ;;  %v839_v5 = vrot.slane %v4781_v37, 7 }
 0x49a   :  { %4142 = vmatpush1.bf16.msra.mxu0 %v4721_v47  ;;  %4149 = vmatpush3.bf16.msra.mxu1 %v4725_v53 }
 0x49b   :  { %4144 = vmatprep.subr.bf16.mxu0 %v4723_v50  ;;  %4150 = vmatprep.subr.bf16.mxu1 %v4620_v49 }
 0x49c   :  { %911 = vmatprep.mubr.f32.mxu0 %v4618_v0  ;;  %3915 = vmatprep.mubr.msk.f32.mxu1 %vm4621_vm3, %v4618_v0 }
 0x49e   :  { %4146 = vmatpush1.bf16.msra.mxu0 %v4728_v56  ;;  %4152 = vmatpush3.bf16.msra.mxu1 %v4733_v57 }
 0x49f   :  { %4154 = vmatprep.subr.bf16.mxu0 %v4716_v10  ;;  %4161 = vmatprep.subr.bf16.mxu1 %v4620_v49 }
 0x56c   :  { %v739_v38 = vpop.f32.mrb[6].mxu0  ;;  %v810_v39 = vpop.f32.mrb[6].mxu1 }
 0x56d   :  { %v816_v40 = vrot.slane %v739_v38, 7  ;;  %v741_v41 = vpop.f32.mrb[7].mxu0  ;;  %v3906_v42 = vpop.f32.mrb[7].mxu1  ;;  %v830_v51 = vadd.f32 %v810_v39, %v4773_v20 }
 0x56e   :  { %v817_v43 = vrot.slane %v741_v41, 7 }
 0x56f   :  { %v820_v44 = vadd.f32 %v816_v40, %v4766_v7  ;;  %v832_v58 = vrot.slane %v830_v51, 7 }
 0x570   :  { %v821_v46 = vadd.f32 %v817_v43, %v4769_v14 }
 0x571   :  { %v822_v45 = vmul.f32 0.5, %v820_v44 }
 0x572   :  { %v823_v48 = vmul.f32 0.5, %v821_v46 }
 0x573   :  { %4392 = vtanh.f32 %v822_v45 }
 0x574   :  { %4394 = vtanh.f32 %v823_v48 }
 0x57d   :  { %v4393_v52 = vpop.eup %4392 }
 0x57e   :  { %v826_v54 = vadd.f32 1.0, %v4393_v52  ;;  %v4395_v62 = vpop.eup %4394 }
 0x57f   :  { %v827_v1 = vadd.f32 1.0, %v4395_v62 }
 0x580   :  { %v828_v55 = vmul.f32 0.5, %v826_v54 }
 0x581   :  { %v829_v2 = vmul.f32 0.5, %v827_v1 }
 0x582   :  { %v834_v59 = vmul.f32 %v832_v58, %v828_v55 }
 0x583   :  { %v837_v3 = vsub.f32 1.0, %v829_v2  ;;  %v841_v9 = vmul.f32 %v839_v5, %v829_v2 }
 0x584   :  { %v835_v63 = vadd.f32 %v834_v59, %v4778_v26 }
 0x586   :  { %4396 = vtanh.f32 %v835_v63 }
 0x590   :  { %v4397_v6 = vpop.eup %4396 }
 0x591   :  { %v838_v8 = vmul.f32 %v4397_v6, %v837_v3 }
 0x593   :  { %v842_v11 = vadd.f32 %v841_v9, %v838_v8 }
 0x595   :  { %v844_v12 = vrot.slane %v842_v11, 1  ;;  %v1013_v38 = vrot.slane %v842_v11, 7  ;;  %v1888_v46 = vsel %vm1887_vm6, %v4781_v37, %v842_v11 }
 0x597   :  { %3728 = vmatmul.mubr.msk.f32.vlgmr.msra.gmra.mrb[8].mxu0 %vm191_vm2, %v844_v12  ;;  %3916 = vmatmul.mubr.msk.f32.vlgmr.msra.gmra.mrb[8].mxu1 %vm191_vm2, %v844_v12 }
 0x598   :  { %4156 = vmatpush1.bf16.msra.mxu0 %v4721_v47  ;;  %4163 = vmatpush3.bf16.msra.mxu1 %v4725_v53 }
 0x599   :  { %4158 = vmatprep.subr.bf16.mxu0 %v4723_v50  ;;  %4164 = vmatprep.subr.bf16.mxu1 %v4620_v49 }
 0x59a   :  { %1085 = vmatprep.mubr.f32.mxu0 %v4618_v0  ;;  %3926 = vmatprep.mubr.msk.f32.mxu1 %vm4621_vm3, %v4618_v0 }
 0x59c   :  { %4160 = vmatpush1.bf16.msra.mxu0 %v4728_v56  ;;  %4166 = vmatpush3.bf16.msra.mxu1 %v4733_v57 }
 0x59d   :  { %4168 = vmatprep.subr.bf16.mxu0 %v4716_v10  ;;  %4175 = vmatprep.subr.bf16.mxu1 %v4620_v49 }
 0x66a   :  { %v913_v15 = vpop.f32.mrb[8].mxu0  ;;  %v984_v16 = vpop.f32.mrb[8].mxu1 }
 0x66b   :  { %v990_v17 = vrot.slane %v913_v15, 6  ;;  %v915_v18 = vpop.f32.mrb[9].mxu0  ;;  %v3917_v21 = vpop.f32.mrb[9].mxu1  ;;  %v1004_v28 = vadd.f32 %v984_v16, %v4773_v20 }
 0x66c   :  { %v991_v22 = vrot.slane %v915_v18, 6 }
 0x66d   :  { %v994_v23 = vadd.f32 %v990_v17, %v4766_v7  ;;  %v1006_v35 = vrot.slane %v1004_v28, 6 }
 0x66e   :  { %v995_v24 = vadd.f32 %v991_v22, %v4769_v14 }
 0x66f   :  { %v996_v25 = vmul.f32 0.5, %v994_v23 }
 0x670   :  { %v997_v27 = vmul.f32 0.5, %v995_v24 }
 0x671   :  { %4398 = vtanh.f32 %v996_v25 }
 0x672   :  { %4400 = vtanh.f32 %v997_v27 }
 0x67b   :  { %v4399_v29 = vpop.eup %4398 }
 0x67c   :  { %v4401_v30 = vpop.eup %4400  ;;  %v1000_v31 = vadd.f32 1.0, %v4399_v29 }
 0x67d   :  { %v1001_v32 = vadd.f32 1.0, %v4401_v30 }
 0x67e   :  { %v1002_v33 = vmul.f32 0.5, %v1000_v31 }
 0x67f   :  { %v1003_v36 = vmul.f32 0.5, %v1001_v32 }
 0x680   :  { %v1008_v39 = vmul.f32 %v1006_v35, %v1002_v33 }
 0x681   :  { %v1015_v40 = vmul.f32 %v1013_v38, %v1003_v36  ;;  %v1011_v42 = vsub.f32 1.0, %v1003_v36 }
 0x682   :  { %v1009_v41 = vadd.f32 %v1008_v39, %v4778_v26 }
 0x684   :  { %4402 = vtanh.f32 %v1009_v41 }
 0x68e   :  { %v4403_v43 = vpop.eup %4402 }
 0x68f   :  { %v1012_v44 = vmul.f32 %v4403_v43, %v1011_v42 }
 0x691   :  { %v1016_v45 = vadd.f32 %v1015_v40, %v1012_v44 }
 0x693   :  { %v1890_v48 = vsel %vm1889_vm7, %v1888_v46, %v1016_v45  ;;  %v1018_v51 = vrot.slane %v1016_v45, 2  ;;  %v1187_v16 = vrot.slane %v1016_v45, 7 }
 0x695   :  { %3730 = vmatmul.mubr.msk.f32.vlgmr.msra.gmra.mrb[10].mxu0 %vm191_vm2, %v1018_v51  ;;  %3927 = vmatmul.mubr.msk.f32.vlgmr.msra.gmra.mrb[10].mxu1 %vm191_vm2, %v1018_v51 }
 0x696   :  { %4170 = vmatpush1.bf16.msra.mxu0 %v4721_v47  ;;  %4177 = vmatpush3.bf16.msra.mxu1 %v4725_v53 }
 0x697   :  { %4172 = vmatprep.subr.bf16.mxu0 %v4723_v50  ;;  %4178 = vmatprep.subr.bf16.mxu1 %v4620_v49 }
 0x698   :  { %1259 = vmatprep.mubr.f32.mxu0 %v4618_v0  ;;  %3937 = vmatprep.mubr.msk.f32.mxu1 %vm4621_vm3, %v4618_v0 }
 0x69a   :  { %4174 = vmatpush1.bf16.msra.mxu0 %v4728_v56  ;;  %4180 = vmatpush3.bf16.msra.mxu1 %v4733_v57 }
 0x69b   :  { %4182 = vmatprep.subr.bf16.mxu0 %v4716_v10  ;;  %4189 = vmatprep.subr.bf16.mxu1 %v4620_v49 }
 0x768   :  { %v1087_v37 = vpop.f32.mrb[10].mxu0  ;;  %v1158_v52 = vpop.f32.mrb[10].mxu1 }
 0x769   :  { %v1164_v54 = vrot.slane %v1087_v37, 5  ;;  %v1089_v55 = vpop.f32.mrb[11].mxu0  ;;  %v3928_v58 = vpop.f32.mrb[11].mxu1  ;;  %v1178_v3 = vadd.f32 %v1158_v52, %v4773_v20 }
 0x76a   :  { %v1165_v59 = vrot.slane %v1089_v55, 5 }
 0x76b   :  { %v1168_v62 = vadd.f32 %v1164_v54, %v4766_v7  ;;  %v1180_v12 = vrot.slane %v1178_v3, 5 }
 0x76c   :  { %v1169_v63 = vadd.f32 %v1165_v59, %v4769_v14 }
 0x76d   :  { %v1170_v1 = vmul.f32 0.5, %v1168_v62 }
 0x76e   :  { %v1171_v2 = vmul.f32 0.5, %v1169_v63 }
 0x76f   :  { %4404 = vtanh.f32 %v1170_v1 }
 0x770   :  { %4406 = vtanh.f32 %v1171_v2 }
 0x779   :  { %v4405_v5 = vpop.eup %4404 }
 0x77a   :  { %v4407_v6 = vpop.eup %4406  ;;  %v1174_v8 = vadd.f32 1.0, %v4405_v5 }
 0x77b   :  { %v1175_v9 = vadd.f32 1.0, %v4407_v6 }
 0x77c   :  { %v1176_v11 = vmul.f32 0.5, %v1174_v8 }
 0x77d   :  { %v1177_v15 = vmul.f32 0.5, %v1175_v9 }
 0x77e   :  { %v1182_v17 = vmul.f32 %v1180_v12, %v1176_v11 }
 0x77f   :  { %v1189_v18 = vmul.f32 %v1187_v16, %v1177_v15  ;;  %v1185_v22 = vsub.f32 1.0, %v1177_v15 }
 0x780   :  { %v1183_v21 = vadd.f32 %v1182_v17, %v4778_v26 }
 0x782   :  { %4408 = vtanh.f32 %v1183_v21 }
 0x78c   :  { %v4409_v23 = vpop.eup %4408 }
 0x78d   :  { %v1186_v24 = vmul.f32 %v4409_v23, %v1185_v22 }
 0x78f   :  { %v1190_v25 = vadd.f32 %v1189_v18, %v1186_v24 }
 0x791   :  { %v1192_v27 = vrot.slane %v1190_v25, 3  ;;  %v1892_v28 = vsel %vm1891_vm8, %v1890_v48, %v1190_v25  ;;  %v1361_v37 = vrot.slane %v1190_v25, 7 }
 0x793   :  { %3732 = vmatmul.mubr.msk.f32.vlgmr.msra.gmra.mrb[12].mxu0 %vm191_vm2, %v1192_v27  ;;  %3938 = vmatmul.mubr.msk.f32.vlgmr.msra.gmra.mrb[12].mxu1 %vm191_vm2, %v1192_v27 }
 0x794   :  { %4184 = vmatpush1.bf16.msra.mxu0 %v4721_v47  ;;  %4191 = vmatpush3.bf16.msra.mxu1 %v4725_v53 }
 0x795   :  { %4186 = vmatprep.subr.bf16.mxu0 %v4723_v50  ;;  %4192 = vmatprep.subr.bf16.mxu1 %v4620_v49 }
 0x796   :  { %1433 = vmatprep.mubr.f32.mxu0 %v4618_v0  ;;  %3948 = vmatprep.mubr.msk.f32.mxu1 %vm4621_vm3, %v4618_v0 }
 0x798   :  { %4188 = vmatpush1.bf16.msra.mxu0 %v4728_v56  ;;  %4194 = vmatpush3.bf16.msra.mxu1 %v4733_v57 }
 0x799   :  { %4196 = vmatprep.subr.bf16.mxu0 %v4716_v10  ;;  %4203 = vmatprep.subr.bf16.mxu1 %v4620_v49 }
 0x866   :  { %v1261_v29 = vpop.f32.mrb[12].mxu0  ;;  %v1332_v30 = vpop.f32.mrb[12].mxu1 }
 0x867   :  { %v1338_v31 = vrot.slane %v1261_v29, 4  ;;  %v1263_v32 = vpop.f32.mrb[13].mxu0  ;;  %v3939_v33 = vpop.f32.mrb[13].mxu1  ;;  %v1352_v41 = vadd.f32 %v1332_v30, %v4773_v20 }
 0x868   :  { %v1339_v35 = vrot.slane %v1263_v32, 4 }
 0x869   :  { %v1342_v36 = vadd.f32 %v1338_v31, %v4766_v7  ;;  %v1354_v48 = vrot.slane %v1352_v41, 4 }
 0x86a   :  { %v1343_v38 = vadd.f32 %v1339_v35, %v4769_v14 }
 0x86b   :  { %v1344_v39 = vmul.f32 0.5, %v1342_v36 }
 0x86c   :  { %v1345_v40 = vmul.f32 0.5, %v1343_v38 }
 0x86d   :  { %4410 = vtanh.f32 %v1344_v39 }
 0x86e   :  { %4412 = vtanh.f32 %v1345_v40 }
 0x877   :  { %v4411_v42 = vpop.eup %4410 }
 0x878   :  { %v4413_v43 = vpop.eup %4412  ;;  %v1348_v44 = vadd.f32 1.0, %v4411_v42 }
 0x879   :  { %v1349_v45 = vadd.f32 1.0, %v4413_v43 }
 0x87a   :  { %v1350_v46 = vmul.f32 0.5, %v1348_v44 }
 0x87b   :  { %v1351_v51 = vmul.f32 0.5, %v1349_v45 }
 0x87c   :  { %v1356_v52 = vmul.f32 %v1354_v48, %v1350_v46 }
 0x87d   :  { %v1363_v54 = vmul.f32 %v1361_v37, %v1351_v51  ;;  %v1359_v58 = vsub.f32 1.0, %v1351_v51 }
 0x87e   :  { %v1357_v55 = vadd.f32 %v1356_v52, %v4778_v26 }
 0x880   :  { %4414 = vtanh.f32 %v1357_v55 }
 0x88a   :  { %v4415_v59 = vpop.eup %4414 }
 0x88b   :  { %v1360_v62 = vmul.f32 %v4415_v59, %v1359_v58 }
 0x88d   :  { %v1364_v63 = vadd.f32 %v1363_v54, %v1360_v62 }
 0x88f   :  { %v1366_v1 = vrot.slane %v1364_v63, 4  ;;  %v1894_v2 = vsel %vm1893_vm9, %v1892_v28, %v1364_v63  ;;  %v1535_v28 = vrot.slane %v1364_v63, 7 }
 0x891   :  { %3734 = vmatmul.mubr.msk.f32.vlgmr.msra.gmra.mrb[14].mxu0 %vm191_vm2, %v1366_v1  ;;  %3949 = vmatmul.mubr.msk.f32.vlgmr.msra.gmra.mrb[14].mxu1 %vm191_vm2, %v1366_v1 }
 0x892   :  { %4198 = vmatpush1.bf16.msra.mxu0 %v4721_v47  ;;  %4205 = vmatpush3.bf16.msra.mxu1 %v4725_v53 }
 0x893   :  { %4200 = vmatprep.subr.bf16.mxu0 %v4723_v50  ;;  %4206 = vmatprep.subr.bf16.mxu1 %v4620_v49 }
 0x894   :  { %1607 = vmatprep.mubr.f32.mxu0 %v4618_v0  ;;  %3959 = vmatprep.mubr.msk.f32.mxu1 %vm4621_vm3, %v4618_v0 }
 0x896   :  { %4202 = vmatpush1.bf16.msra.mxu0 %v4728_v56  ;;  %4208 = vmatpush3.bf16.msra.mxu1 %v4733_v57 }
 0x897   :  { %4210 = vmatprep.subr.bf16.mxu0 %v4716_v10  ;;  %4217 = vmatprep.subr.bf16.mxu1 %v4620_v49 }
 0x964   :  { %v1435_v3 = vpop.f32.mrb[14].mxu0  ;;  %v1506_v5 = vpop.f32.mrb[14].mxu1 }
 0x965   :  { %v1512_v6 = vrot.slane %v1435_v3, 3  ;;  %v1437_v8 = vpop.f32.mrb[15].mxu0  ;;  %v3950_v9 = vpop.f32.mrb[15].mxu1  ;;  %v1526_v18 = vadd.f32 %v1506_v5, %v4773_v20 }
 0x966   :  { %v1513_v11 = vrot.slane %v1437_v8, 3  ;;  %v1902_v9 = vld [vmem:[#allocation7 + $0xe0] sm:$0xff] }
 0x967   :  { %v1516_v12 = vadd.f32 %v1512_v6, %v4766_v7  ;;  %v1528_v25 = vrot.slane %v1526_v18, 3  ;;  %v1903_v18 = vld [vmem:[#allocation7 + $0xe8] sm:$0xff] }
 0x968   :  { %v1517_v15 = vadd.f32 %v1513_v11, %v4769_v14  ;;  %v1905_v11 = vld [vmem:[#allocation7 + $0xf8] sm:$0xff] }
 0x969   :  { %v1518_v16 = vmul.f32 0.5, %v1516_v12  ;;  %v4223_v12 = vpack.c.bf16 %v1905_v11, %v1902_v9 }
 0x96a   :  { %v1519_v17 = vmul.f32 0.5, %v1517_v15  ;;  %v1901_v15 = vld [vmem:[#allocation7 + $0xd8] sm:$0xff] }
 0x96b   :  { %4416 = vtanh.f32 %v1518_v16  ;;  %v1904_v16 = vld [vmem:[#allocation7 + $0xf0] sm:$0xff] }
 0x96c   :  { %4418 = vtanh.f32 %v1519_v17  ;;  %v4225_v17 = vpack.c.bf16 %v1904_v16, %v1901_v15  ;;  %v1921_v16 = vld [vmem:[#allocation7 + $0x178] sm:$0xff] }
 0x975   :  { %v4417_v21 = vpop.eup %4416 }
 0x976   :  { %v4419_v10 = vpop.eup %4418  ;;  %v1522_v22 = vadd.f32 1.0, %v4417_v21  ;;  %v1906_v21 = vld [vmem:[#allocation7 + $0x100] sm:$0xff] }
 0x977   :  { %v1523_v23 = vadd.f32 1.0, %v4419_v10  ;;  %v4232_v10 = vpack.c.bf16 %v1906_v21, %v1903_v18 }
 0x978   :  { %v1524_v24 = vmul.f32 0.5, %v1522_v22  ;;  %v1908_v22 = vld [vmem:[#allocation7 + $0x110] sm:$0xff] }
 0x979   :  { %v1525_v27 = vmul.f32 0.5, %v1523_v23  ;;  %v1911_v23 = vld [vmem:[#allocation7 + $0x128] sm:$0xff] }
 0x97a   :  { %v1530_v29 = vmul.f32 %v1528_v25, %v1524_v24  ;;  %v4227_v24 = vpack.c.bf16 %v1911_v23, %v1908_v22  ;;  %v1907_v25 = vld [vmem:[#allocation7 + $0x108] sm:$0xff] }
 0x97b   :  { %v1537_v30 = vmul.f32 %v1535_v28, %v1525_v27  ;;  %v1533_v32 = vsub.f32 1.0, %v1525_v27  ;;  %v1910_v27 = vld [vmem:[#allocation7 + $0x120] sm:$0xff] }
 0x97c   :  { %v1531_v31 = vadd.f32 %v1530_v29, %v4778_v26  ;;  %v4229_v28 = vpack.c.bf16 %v1910_v27, %v1907_v25  ;;  %v1909_v29 = vld [vmem:[#allocation7 + $0x118] sm:$0xff] }
 0x97e   :  { %4420 = vtanh.f32 %v1531_v31 }
 0x988   :  { %v4421_v33 = vpop.eup %4420 }
 0x989   :  { %v1534_v35 = vmul.f32 %v4421_v33, %v1533_v32  ;;  %v1914_v32 = vld [vmem:[#allocation7 + $0x140] sm:$0xff]  ;;  %v1917_v33 = vld [vmem:[#allocation7 + $0x158] sm:$0xff] }
 0x98b   :  { %v1538_v36 = vadd.f32 %v1537_v30, %v1534_v35  ;;  %v1912_v30 = vld [vmem:[#allocation7 + $0x130] sm:$0xff]  ;;  %v4902_v35 = vpack.c.bf16 %v1917_v33, %v1914_v32 }
 0x98c   :  { %v4235_v31 = vpack.c.bf16 %v1912_v30, %v1909_v29 }
 0x98d   :  { %v1540_v38 = vrot.slane %v1538_v36, 5  ;;  %v1896_v39 = vsel %vm1895_vm10, %v1894_v2, %v1538_v36  ;;  %v1709_v58 = vrot.slane %v1538_v36, 7 }
 0x98f   :  { %3736 = vmatmul.mubr.msk.f32.vlgmr.msra.gmra.mrb[16].mxu0 %vm191_vm2, %v1540_v38  ;;  %3960 = vmatmul.mubr.msk.f32.vlgmr.msra.gmra.mrb[16].mxu1 %vm191_vm2, %v1540_v38 }
 0x990   :  { %4212 = vmatpush1.bf16.msra.mxu0 %v4721_v47  ;;  %4219 = vmatpush3.bf16.msra.mxu1 %v4725_v53 }
 0x991   :  { %4214 = vmatprep.subr.bf16.mxu0 %v4723_v50  ;;  %4220 = vmatprep.subr.bf16.mxu1 %v4620_v49 }
 0x992   :  { %1781 = vmatprep.mubr.f32.mxu0 %v4618_v0  ;;  %3970 = vmatprep.mubr.msk.f32.mxu1 %vm4621_vm3, %v4618_v0 }
 0x994   :  { %4216 = vmatpush1.bf16.msra.mxu0 %v4728_v56  ;;  %4222 = vmatpush3.bf16.msra.mxu1 %v4733_v57 }
 0x995   :  { %4231 = vmatprep.subr.bf16.mxu1 %v4620_v49  ;;  %4224 = vmatprep.subr.bf16.mxu0 %v4223_v12  ;;  %v1922_v12 = vld [vmem:[#allocation7 + $0x180] sm:$0xff] }
 0xa62   :  { %v1609_v40 = vpop.f32.mrb[16].mxu0  ;;  %v1680_v41 = vpop.f32.mrb[16].mxu1 }
 0xa63   :  { %v1686_v47 = vrot.slane %v1609_v40, 2  ;;  %v1611_v42 = vpop.f32.mrb[17].mxu0  ;;  %v3961_v53 = vpop.f32.mrb[17].mxu1  ;;  %v1700_v56 = vadd.f32 %v1680_v41, %v4773_v20 }
 0xa64   :  { %v1687_v43 = vrot.slane %v1611_v42, 2 }
 0xa65   :  { %v1690_v50 = vadd.f32 %v1686_v47, %v4766_v7  ;;  %v1702_v54 = vrot.slane %v1700_v56, 2 }
 0xa66   :  { %v1691_v44 = vadd.f32 %v1687_v43, %v4769_v14 }
 0xa67   :  { %v1692_v45 = vmul.f32 0.5, %v1690_v50 }
 0xa68   :  { %v1693_v46 = vmul.f32 0.5, %v1691_v44 }
 0xa69   :  { %4422 = vtanh.f32 %v1692_v45 }
 0xa6a   :  { %4424 = vtanh.f32 %v1693_v46 }
 0xa73   :  { %v4423_v48 = vpop.eup %4422 }
 0xa74   :  { %v4425_v57 = vpop.eup %4424  ;;  %v1696_v51 = vadd.f32 1.0, %v4423_v48 }
 0xa75   :  { %v1697_v37 = vadd.f32 1.0, %v4425_v57 }
 0xa76   :  { %v1698_v52 = vmul.f32 0.5, %v1696_v51 }
 0xa77   :  { %v1699_v55 = vmul.f32 0.5, %v1697_v37 }
 0xa78   :  { %v1704_v59 = vmul.f32 %v1702_v54, %v1698_v52 }
 0xa79   :  { %v1711_v62 = vmul.f32 %v1709_v58, %v1699_v55  ;;  %v1707_v1 = vsub.f32 1.0, %v1699_v55 }
 0xa7a   :  { %v1705_v63 = vadd.f32 %v1704_v59, %v4778_v26  ;;  %v1913_v59 = vld [vmem:[#allocation7 + $0x138] sm:$0xff] }
 0xa7c   :  { %4426 = vtanh.f32 %v1705_v63  ;;  %v1920_v63 = vld [vmem:[#allocation7 + $0x170] sm:$0xff] }
 0xa86   :  { %v4427_v2 = vpop.eup %4426 }
 0xa87   :  { %v1708_v3 = vmul.f32 %v4427_v2, %v1707_v1  ;;  %v1915_v2 = vld [vmem:[#allocation7 + $0x148] sm:$0xff] }
 0xa89   :  { %v1712_v5 = vadd.f32 %v1711_v62, %v1708_v3  ;;  %v1916_v62 = vld [vmem:[#allocation7 + $0x150] sm:$0xff]  ;;  %v1918_v3 = vld [vmem:[#allocation7 + $0x160] sm:$0xff] }
 0xa8a   :  { %v4910_v9 = vpack.c.bf16 %v1916_v62, %v1913_v59  ;;  %v4914_v15 = vpack.c.bf16 %v1918_v3, %v1915_v2 }
 0xa8b   :  { %v1714_v6 = vrot.slane %v1712_v5, 6  ;;  %v4894_v8 = vsel %vm1897_vm11, %v1896_v39, %v1712_v5  ;;  %v1883_v52 = vrot.slane %v1712_v5, 7  ;;  %v1919_v5 = vld [vmem:[#allocation7 + $0x168] sm:$0xff] }
 0xa8c   :  { %v4921_v18 = vpack.c.bf16 %v1922_v12, %v1919_v5 }
 0xa8d   :  { %3738 = vmatmul.mubr.msk.f32.vlgmr.msra.gmra.mrb[18].mxu0 %vm191_vm2, %v1714_v6  ;;  %3971 = vmatmul.mubr.msk.f32.vlgmr.msra.gmra.mrb[18].mxu1 %vm191_vm2, %v1714_v6 }
 0xa8e   :  { %2011 = vmatprep.mubr.f32.mxu0 %v4618_v0  ;;  %3981 = vmatprep.mubr.msk.f32.mxu1 %vm4621_vm3, %v4618_v0 }
 0xa8f   :  { %4226 = vmatpush1.bf16.msra.mxu0 %v4225_v17  ;;  %4233 = vmatpush3.bf16.msra.mxu1 %v4232_v10  ;;  %v1924_v17 = vld [vmem:[#allocation7 + $0x190] sm:$0xff]  ;;  %v1926_v10 = vld [vmem:[#allocation7 + $0x198] ss:$8 sm:$0x7] }
 0xa90   :  { %4234 = vmatprep.subr.bf16.mxu1 %v4620_v49  ;;  %4228 = vmatprep.subr.bf16.mxu0 %v4227_v24  ;;  %v4926_v21 = vpack.c.bf16 %v1924_v17, %v1921_v16  ;;  %v1932_v27 = vrot.slane %v1926_v10, %v349_v61  ;;  %v4961_v61 = vld [vmem:[#allocation7 + $0x199] ss:$0 sm:$0xff] }
 0xa93   :  { %4230 = vmatpush1.bf16.msra.mxu0 %v4229_v28  ;;  %4236 = vmatpush3.bf16.msra.mxu1 %v4235_v31  ;;  %v1936_v28 = vrot.slane %v1926_v10, %v353_v4  ;;  %v1940_v4 = vrot.slane %v1926_v10, %v357_v19 }
 0xa94   :  { %4238 = vmatprep.subr.bf16.mxu0 %v4902_v35  ;;  %4245 = vmatprep.subr.bf16.mxu1 %v4620_v49 }
 0xb60   :  { %v1783_v36 = vpop.f32.mrb[18].mxu0  ;;  %v1854_v38 = vpop.f32.mrb[18].mxu1 }
 0xb61   :  { %v1860_v39 = vrot.slane %v1783_v36, 1  ;;  %v1785_v40 = vpop.f32.mrb[19].mxu0  ;;  %v3972_v41 = vpop.f32.mrb[19].mxu1  ;;  %v1874_v44 = vadd.f32 %v1854_v38, %v4773_v20  ;;  %v1923_v20 = vld [vmem:[#allocation7 + $0x188] sm:$0xff] }
 0xb62   :  { %v1861_v47 = vrot.slane %v1785_v40, 1  ;;  %v4912_v11 = vpack.c.bf16 %v1923_v20, %v1920_v63 }
 0xb63   :  { %v1864_v42 = vadd.f32 %v1860_v39, %v4766_v7  ;;  %v1876_v51 = vrot.slane %v1874_v44, 1 }
 0xb64   :  { %v1865_v53 = vadd.f32 %v1861_v47, %v4769_v14 }
 0xb65   :  { %v1866_v43 = vmul.f32 0.5, %v1864_v42 }
 0xb66   :  { %v1867_v50 = vmul.f32 0.5, %v1865_v53 }
 0xb67   :  { %4428 = vtanh.f32 %v1866_v43 }
 0xb68   :  { %4430 = vtanh.f32 %v1867_v50 }
 0xb71   :  { %v4429_v45 = vpop.eup %4428 }
 0xb72   :  { %v4431_v46 = vpop.eup %4430  ;;  %v1870_v56 = vadd.f32 1.0, %v4429_v45 }
 0xb73   :  { %v1871_v48 = vadd.f32 1.0, %v4431_v46 }
 0xb74   :  { %v1872_v57 = vmul.f32 0.5, %v1870_v56 }
 0xb75   :  { %v1873_v37 = vmul.f32 0.5, %v1871_v48 }
 0xb76   :  { %v1878_v54 = vmul.f32 %v1876_v51, %v1872_v57 }
 0xb77   :  { %v1885_v55 = vmul.f32 %v1883_v52, %v1873_v37  ;;  %v1881_v14 = vsub.f32 1.0, %v1873_v37 }
 0xb78   :  { %v1879_v7 = vadd.f32 %v1878_v54, %v4778_v26 }
 0xb7a   :  { %4432 = vtanh.f32 %v1879_v7 }
 0xb84   :  { %v4433_v58 = vpop.eup %4432 }
 0xb85   :  { %v1882_v1 = vmul.f32 %v4433_v58, %v1881_v14 }
 0xb87   :  { %v1886_v6 = vadd.f32 %v1885_v55, %v1882_v1 }
 0xb89   :  { %v1900_v26 = vsel %vm1899_vm12, %v4894_v8, %v1886_v6  ;;  %v2088_v8 = vld [vmem:[%s5115_s1 + $0x1] sm:$0x1]  ;;  %s4622_s1 = smov [#allocation10]  }
 0xb8a   :  { %3740 = vmatmul.mubr.msk.f32.vlgmr.msra.gmra.mrb[20].mxu0 %vm191_vm2, %v1900_v26  ;;  %3982 = vmatmul.mubr.msk.f32.vlgmr.msra.gmra.mrb[20].mxu1 %vm191_vm2, %v1900_v26  ;;  %s3705_s21 = sshll.u32 %s4622_s1, 4  ;;  %s3706_s21 = int_to_ptr.vmem [resolvable:$true] %s3705_s21 }
 0xb8b   :  { %4240 = vmatpush1.bf16.msra.mxu0 %v4910_v9  ;;  %2156 = vmatprep.mubr.f32.mxu0 %v4618_v0  ;;  %s4578_s22 = scalar_lea.vmem %s3706_s21, 128  ;;  %p4583_p5 = scmp.lt.s32.totalorder %s3706_s21, %s3706_s21 }
 0xb8c   :  { %4242 = vmatprep.subr.bf16.mxu0 %v4912_v11  ;;  %4247 = vmatpush3.bf16.msra.mxu1 %v4914_v15  ;;  %p4579_p4 = scmp.ne.s32.totalorder %s3706_s21, %s4578_s22  ;;  %p4584_p6 = scmp.lt.s32.totalorder %s4578_s22, %s4578_s22 }
 0xb8d   :  { %4248 = vmatprep.subr.bf16.mxu1 %v4620_v49  ;;  %3992 = vmatprep.mubr.msk.f32.mxu1 %vm4621_vm3, %v4618_v0 }
 0xb8e   :  { %p4585_p7 = por %p4584_p6, %p4583_p5 }
 0xb8f   :  { %4244 = vmatpush1.bf16.msra.mxu0 %v4921_v18 }
 0xb90   :  { %4250 = vmatpush3.bf16.msra.mxu1 %v4926_v21  ;;  %4252 = vmatprep.subr.bf16.mxu0 %v4902_v35  ;;  %p4586_p8 = pnand %p4585_p7, %p4579_p4 }
 0xb91   :  { %4259 = vmatprep.subr.bf16.mxu1 %v4620_v49 }
 0xb92   :  { %3742 = vmatmul.mubr.msk.f32.vlgmr.msra.gmra.mrb[22].mxu0 %vm191_vm2, %v2088_v8 }
 0xb93   :  { %3993 = vmatmul.mubr.msk.f32.vlgmr.msra.gmra.mrb[22].mxu1 %vm191_vm2, %v2088_v8  ;;  %4254 = vmatpush1.bf16.msra.mxu0 %v4910_v9 }
 0xb94   :  { %4261 = vmatpush3.bf16.msra.mxu1 %v4914_v15  ;;  %4256 = vmatprep.subr.bf16.mxu0 %v4912_v11 }
 0xb95   :  { %4262 = vmatprep.subr.bf16.mxu1 %v4620_v49  ;;  %2318 = vmatprep.mubr.f32.mxu0 %v4618_v0 }
 0xb96   :  { %4003 = vmatprep.mubr.msk.f32.mxu1 %vm4621_vm3, %v4618_v0 }
 0xb97   :  { %4258 = vmatpush1.bf16.msra.mxu0 %v4921_v18 }
 0xb98   :  { %4264 = vmatpush3.bf16.msra.mxu1 %v4926_v21  ;;  %4266 = vmatprep.subr.bf16.mxu0 %v4902_v35 }
 0xb99   :  { %4273 = vmatprep.subr.bf16.mxu1 %v4620_v49 }
 0xc5d   :  { %v2013_v22 = vpop.f32.mrb[20].mxu0  ;;  %v2084_v23 = vpop.f32.mrb[20].mxu1 }
 0xc5e   :  { %v2015_v24 = vpop.f32.mrb[21].mxu0  ;;  %v3983_v25 = vpop.f32.mrb[21].mxu1  ;;  %v4955_v29 = vadd.f32 %v2013_v22, %v1932_v27  ;;  %v4966_v50 = vadd.f32 %v2084_v23, %v1940_v4 }
 0xc5f   :  { %v4958_v36 = vadd.f32 %v2015_v24, %v1936_v28 }
 0xc65   :  { %v2158_v30 = vpop.f32.mrb[22].mxu0 }
 0xc66   :  { %v2233_v31 = vadd.f32 %v2158_v30, %v4955_v29  ;;  %v2160_v32 = vpop.f32.mrb[23].mxu0  ;;  %v2229_v33 = vpop.f32.mrb[22].mxu1 }
 0xc67   :  { %v3994_v38 = vpop.f32.mrb[23].mxu1  ;;  %v2234_v40 = vadd.f32 %v2160_v32, %v4958_v36  ;;  %v2243_v53 = vadd.f32 %v2229_v33, %v4961_v61 }
 0xc68   :  { %v2235_v39 = vmul.f32 0.5, %v2233_v31 }
 0xc69   :  { %v2236_v41 = vmul.f32 0.5, %v2234_v40 }
 0xc6a   :  { %4434 = vtanh.f32 %v2235_v39 }
 0xc6b   :  { %4436 = vtanh.f32 %v2236_v41 }
 0xc74   :  { %v4435_v47 = vpop.eup %4434 }
 0xc75   :  { %v2239_v42 = vadd.f32 1.0, %v4435_v47  ;;  %v4437_v45 = vpop.eup %4436 }
 0xc76   :  { %v2240_v56 = vadd.f32 1.0, %v4437_v45 }
 0xc77   :  { %v2241_v43 = vmul.f32 0.5, %v2239_v42 }
 0xc78   :  { %v2242_v48 = vmul.f32 0.5, %v2240_v56 }
 0xc79   :  { %v2244_v44 = vmul.f32 %v2243_v53, %v2241_v43 }
 0xc7a   :  { %v2247_v57 = vsub.f32 1.0, %v2242_v48  ;;  %v2249_v37 = vmul.f32 %v2242_v48, %v2088_v8 }
 0xc7b   :  { %v2245_v46 = vadd.f32 %v2244_v44, %v4966_v50 }
 0xc7d   :  { %4438 = vtanh.f32 %v2245_v46 }
 0xc87   :  { %v4439_v51 = vpop.eup %4438 }
 0xc88   :  { %v2248_v52 = vmul.f32 %v4439_v51, %v2247_v57 }
 0xc8a   :  { %v4969_v54 = vadd.f32 %v2249_v37, %v2248_v52 }
 0xc8c   :  { %3744 = vmatmul.mubr.msk.f32.vlgmr.msra.gmra.mrb[24].mxu0 %vm191_vm2, %v4969_v54  ;;  %4004 = vmatmul.mubr.msk.f32.vlgmr.msra.gmra.mrb[24].mxu1 %vm191_vm2, %v4969_v54  ;;  %v2420_v22 = vrot.slane %v4969_v54, 7 }
 0xc8d   :  { %4268 = vmatpush1.bf16.msra.mxu0 %v4910_v9  ;;  %4275 = vmatpush3.bf16.msra.mxu1 %v4914_v15 }
 0xc8e   :  { %4270 = vmatprep.subr.bf16.mxu0 %v4912_v11  ;;  %4276 = vmatprep.subr.bf16.mxu1 %v4620_v49 }
 0xc8f   :  { %2492 = vmatprep.mubr.f32.mxu0 %v4618_v0  ;;  %4014 = vmatprep.mubr.msk.f32.mxu1 %vm4621_vm3, %v4618_v0 }
 0xc91   :  { %4272 = vmatpush1.bf16.msra.mxu0 %v4921_v18  ;;  %4278 = vmatpush3.bf16.msra.mxu1 %v4926_v21 }
 0xc92   :  { %4280 = vmatprep.subr.bf16.mxu0 %v4902_v35  ;;  %4287 = vmatprep.subr.bf16.mxu1 %v4620_v49 }
 0xd5f   :  { %v2320_v60 = vpop.f32.mrb[24].mxu0  ;;  %v2391_v19 = vpop.f32.mrb[24].mxu1 }
 0xd60   :  { %v2397_v55 = vrot.slane %v2320_v60, 7  ;;  %v2322_v7 = vpop.f32.mrb[25].mxu0  ;;  %v4005_v14 = vpop.f32.mrb[25].mxu1  ;;  %v2411_v20 = vadd.f32 %v2391_v19, %v4961_v61 }
 0xd61   :  { %v2398_v58 = vrot.slane %v2322_v7, 7 }
 0xd62   :  { %v2401_v59 = vadd.f32 %v2397_v55, %v4955_v29  ;;  %v2413_v5 = vrot.slane %v2411_v20, 7 }
 0xd63   :  { %v2402_v63 = vadd.f32 %v2398_v58, %v4958_v36 }
 0xd64   :  { %v2403_v62 = vmul.f32 0.5, %v2401_v59 }
 0xd65   :  { %v2404_v1 = vmul.f32 0.5, %v2402_v63 }
 0xd66   :  { %4440 = vtanh.f32 %v2403_v62 }
 0xd67   :  { %4442 = vtanh.f32 %v2404_v1 }
 0xd70   :  { %v4441_v2 = vpop.eup %4440 }
 0xd71   :  { %v2407_v3 = vadd.f32 1.0, %v4441_v2  ;;  %v4443_v26 = vpop.eup %4442 }
 0xd72   :  { %v2408_v17 = vadd.f32 1.0, %v4443_v26 }
 0xd73   :  { %v2409_v6 = vmul.f32 0.5, %v2407_v3 }
 0xd74   :  { %v2410_v8 = vmul.f32 0.5, %v2408_v17 }
 0xd75   :  { %v2415_v12 = vmul.f32 %v2413_v5, %v2409_v6 }
 0xd76   :  { %v2418_v10 = vsub.f32 1.0, %v2410_v8  ;;  %v2422_v25 = vmul.f32 %v2420_v22, %v2410_v8 }
 0xd77   :  { %v2416_v16 = vadd.f32 %v2415_v12, %v4966_v50 }
 0xd79   :  { %4444 = vtanh.f32 %v2416_v16 }
 0xd83   :  { %v4445_v23 = vpop.eup %4444 }
 0xd84   :  { %v2419_v24 = vmul.f32 %v4445_v23, %v2418_v10 }
 0xd86   :  { %v2423_v27 = vadd.f32 %v2422_v25, %v2419_v24 }
 0xd88   :  { %v2425_v28 = vrot.slane %v2423_v27, 1  ;;  %v2594_v57 = vrot.slane %v2423_v27, 7  ;;  %v3468_v14 = vsel %vm1887_vm6, %v4969_v54, %v2423_v27 }
 0xd8a   :  { %3746 = vmatmul.mubr.msk.f32.vlgmr.msra.gmra.mrb[26].mxu0 %vm191_vm2, %v2425_v28  ;;  %4015 = vmatmul.mubr.msk.f32.vlgmr.msra.gmra.mrb[26].mxu1 %vm191_vm2, %v2425_v28 }
 0xd8b   :  { %4282 = vmatpush1.bf16.msra.mxu0 %v4910_v9  ;;  %4289 = vmatpush3.bf16.msra.mxu1 %v4914_v15 }
 0xd8c   :  { %4284 = vmatprep.subr.bf16.mxu0 %v4912_v11  ;;  %4290 = vmatprep.subr.bf16.mxu1 %v4620_v49 }
 0xd8d   :  { %2666 = vmatprep.mubr.f32.mxu0 %v4618_v0  ;;  %4025 = vmatprep.mubr.msk.f32.mxu1 %vm4621_vm3, %v4618_v0 }
 0xd8f   :  { %4286 = vmatpush1.bf16.msra.mxu0 %v4921_v18  ;;  %4292 = vmatpush3.bf16.msra.mxu1 %v4926_v21 }
 0xd90   :  { %4294 = vmatprep.subr.bf16.mxu0 %v4902_v35  ;;  %4301 = vmatprep.subr.bf16.mxu1 %v4620_v49 }
 0xe5d   :  { %v2494_v30 = vpop.f32.mrb[26].mxu0  ;;  %v2565_v31 = vpop.f32.mrb[26].mxu1 }
 0xe5e   :  { %v2571_v32 = vrot.slane %v2494_v30, 6  ;;  %v2496_v33 = vpop.f32.mrb[27].mxu0  ;;  %v4016_v38 = vpop.f32.mrb[27].mxu1  ;;  %v2585_v42 = vadd.f32 %v2565_v31, %v4961_v61 }
 0xe5f   :  { %v2572_v39 = vrot.slane %v2496_v33, 6 }
 0xe60   :  { %v2575_v40 = vadd.f32 %v2571_v32, %v4955_v29  ;;  %v2587_v56 = vrot.slane %v2585_v42, 6 }
 0xe61   :  { %v2576_v41 = vadd.f32 %v2572_v39, %v4958_v36 }
 0xe62   :  { %v2577_v47 = vmul.f32 0.5, %v2575_v40 }
 0xe63   :  { %v2578_v4 = vmul.f32 0.5, %v2576_v41 }
 0xe64   :  { %4446 = vtanh.f32 %v2577_v47 }
 0xe65   :  { %4448 = vtanh.f32 %v2578_v4 }
 0xe6e   :  { %v4447_v53 = vpop.eup %4446 }
 0xe6f   :  { %v4449_v43 = vpop.eup %4448  ;;  %v2581_v44 = vadd.f32 1.0, %v4447_v53 }
 0xe70   :  { %v2582_v45 = vadd.f32 1.0, %v4449_v43 }
 0xe71   :  { %v2583_v46 = vmul.f32 0.5, %v2581_v44 }
 0xe72   :  { %v2584_v48 = vmul.f32 0.5, %v2582_v45 }
 0xe73   :  { %v2589_v51 = vmul.f32 %v2587_v56, %v2583_v46 }
 0xe74   :  { %v2596_v37 = vmul.f32 %v2594_v57, %v2584_v48  ;;  %v2592_v60 = vsub.f32 1.0, %v2584_v48 }
 0xe75   :  { %v2590_v52 = vadd.f32 %v2589_v51, %v4966_v50 }
 0xe77   :  { %4450 = vtanh.f32 %v2590_v52 }
 0xe81   :  { %v4451_v19 = vpop.eup %4450 }
 0xe82   :  { %v2593_v55 = vmul.f32 %v4451_v19, %v2592_v60 }
 0xe84   :  { %v2597_v7 = vadd.f32 %v2596_v37, %v2593_v55 }
 0xe86   :  { %v3469_v58 = vsel %vm1889_vm7, %v3468_v14, %v2597_v7  ;;  %v2599_v59 = vrot.slane %v2597_v7, 2  ;;  %v2768_v25 = vrot.slane %v2597_v7, 7 }
 0xe88   :  { %3748 = vmatmul.mubr.msk.f32.vlgmr.msra.gmra.mrb[28].mxu0 %vm191_vm2, %v2599_v59  ;;  %4026 = vmatmul.mubr.msk.f32.vlgmr.msra.gmra.mrb[28].mxu1 %vm191_vm2, %v2599_v59 }
 0xe89   :  { %4296 = vmatpush1.bf16.msra.mxu0 %v4910_v9  ;;  %4303 = vmatpush3.bf16.msra.mxu1 %v4914_v15 }
 0xe8a   :  { %4298 = vmatprep.subr.bf16.mxu0 %v4912_v11  ;;  %4304 = vmatprep.subr.bf16.mxu1 %v4620_v49 }
 0xe8b   :  { %2840 = vmatprep.mubr.f32.mxu0 %v4618_v0  ;;  %4036 = vmatprep.mubr.msk.f32.mxu1 %vm4621_vm3, %v4618_v0 }
 0xe8d   :  { %4300 = vmatpush1.bf16.msra.mxu0 %v4921_v18  ;;  %4306 = vmatpush3.bf16.msra.mxu1 %v4926_v21 }
 0xe8e   :  { %4308 = vmatprep.subr.bf16.mxu0 %v4902_v35  ;;  %4315 = vmatprep.subr.bf16.mxu1 %v4620_v49 }
 0xf5b   :  { %v2668_v54 = vpop.f32.mrb[28].mxu0  ;;  %v2739_v62 = vpop.f32.mrb[28].mxu1 }
 0xf5c   :  { %v2745_v63 = vrot.slane %v2668_v54, 5  ;;  %v2670_v1 = vpop.f32.mrb[29].mxu0  ;;  %v4027_v20 = vpop.f32.mrb[29].mxu1  ;;  %v2759_v26 = vadd.f32 %v2739_v62, %v4961_v61 }
 0xf5d   :  { %v2746_v2 = vrot.slane %v2670_v1, 5 }
 0xf5e   :  { %v2749_v3 = vadd.f32 %v2745_v63, %v4955_v29  ;;  %v2761_v23 = vrot.slane %v2759_v26, 5 }
 0xf5f   :  { %v2750_v6 = vadd.f32 %v2746_v2, %v4958_v36 }
 0xf60   :  { %v2751_v5 = vmul.f32 0.5, %v2749_v3 }
 0xf61   :  { %v2752_v12 = vmul.f32 0.5, %v2750_v6 }
 0xf62   :  { %4452 = vtanh.f32 %v2751_v5 }
 0xf63   :  { %4454 = vtanh.f32 %v2752_v12 }
 0xf6c   :  { %v4453_v16 = vpop.eup %4452 }
 0xf6d   :  { %v4455_v17 = vpop.eup %4454  ;;  %v2755_v8 = vadd.f32 1.0, %v4453_v16 }
 0xf6e   :  { %v2756_v10 = vadd.f32 1.0, %v4455_v17 }
 0xf6f   :  { %v2757_v22 = vmul.f32 0.5, %v2755_v8 }
 0xf70   :  { %v2758_v24 = vmul.f32 0.5, %v2756_v10 }
 0xf71   :  { %v2763_v27 = vmul.f32 %v2761_v23, %v2757_v22 }
 0xf72   :  { %v2770_v28 = vmul.f32 %v2768_v25, %v2758_v24  ;;  %v2766_v31 = vsub.f32 1.0, %v2758_v24 }
 0xf73   :  { %v2764_v30 = vadd.f32 %v2763_v27, %v4966_v50 }
 0xf75   :  { %4456 = vtanh.f32 %v2764_v30 }
 0xf7f   :  { %v4457_v32 = vpop.eup %4456 }
 0xf80   :  { %v2767_v33 = vmul.f32 %v4457_v32, %v2766_v31 }
 0xf82   :  { %v2771_v38 = vadd.f32 %v2770_v28, %v2767_v33 }
 0xf84   :  { %v2773_v39 = vrot.slane %v2771_v38, 3  ;;  %v3470_v40 = vsel %vm1891_vm8, %v3469_v58, %v2771_v38  ;;  %v2942_v7 = vrot.slane %v2771_v38, 7 }
 0xf86   :  { %3750 = vmatmul.mubr.msk.f32.vlgmr.msra.gmra.mrb[30].mxu0 %vm191_vm2, %v2773_v39  ;;  %4037 = vmatmul.mubr.msk.f32.vlgmr.msra.gmra.mrb[30].mxu1 %vm191_vm2, %v2773_v39 }
 0xf87   :  { %4310 = vmatpush1.bf16.msra.mxu0 %v4910_v9  ;;  %4317 = vmatpush3.bf16.msra.mxu1 %v4914_v15 }
 0xf88   :  { %4312 = vmatprep.subr.bf16.mxu0 %v4912_v11  ;;  %4318 = vmatprep.subr.bf16.mxu1 %v4620_v49 }
 0xf89   :  { %3014 = vmatprep.mubr.f32.mxu0 %v4618_v0  ;;  %4047 = vmatprep.mubr.msk.f32.mxu1 %vm4621_vm3, %v4618_v0 }
 0xf8b   :  { %4314 = vmatpush1.bf16.msra.mxu0 %v4921_v18  ;;  %4320 = vmatpush3.bf16.msra.mxu1 %v4926_v21 }
 0xf8c   :  { %4322 = vmatprep.subr.bf16.mxu0 %v4902_v35  ;;  %4329 = vmatprep.subr.bf16.mxu1 %v4620_v49 }
0x1059   :  { %v2842_v41 = vpop.f32.mrb[30].mxu0  ;;  %v2913_v47 = vpop.f32.mrb[30].mxu1 }
0x105a   :  { %v2919_v4 = vrot.slane %v2842_v41, 4  ;;  %v2844_v42 = vpop.f32.mrb[31].mxu0  ;;  %v4038_v53 = vpop.f32.mrb[31].mxu1  ;;  %v2933_v48 = vadd.f32 %v2913_v47, %v4961_v61 }
0x105b   :  { %v2920_v43 = vrot.slane %v2844_v42, 4 }
0x105c   :  { %v2923_v44 = vadd.f32 %v2919_v4, %v4955_v29  ;;  %v2935_v19 = vrot.slane %v2933_v48, 4 }
0x105d   :  { %v2924_v45 = vadd.f32 %v2920_v43, %v4958_v36 }
0x105e   :  { %v2925_v46 = vmul.f32 0.5, %v2923_v44 }
0x105f   :  { %v2926_v56 = vmul.f32 0.5, %v2924_v45 }
0x1060   :  { %4458 = vtanh.f32 %v2925_v46 }
0x1061   :  { %4460 = vtanh.f32 %v2926_v56 }
0x106a   :  { %v4459_v57 = vpop.eup %4458 }
0x106b   :  { %v4461_v51 = vpop.eup %4460  ;;  %v2929_v37 = vadd.f32 1.0, %v4459_v57 }
0x106c   :  { %v2930_v52 = vadd.f32 1.0, %v4461_v51 }
0x106d   :  { %v2931_v60 = vmul.f32 0.5, %v2929_v37 }
0x106e   :  { %v2932_v55 = vmul.f32 0.5, %v2930_v52 }
0x106f   :  { %v2937_v14 = vmul.f32 %v2935_v19, %v2931_v60 }
0x1070   :  { %v2944_v58 = vmul.f32 %v2942_v7, %v2932_v55  ;;  %v2940_v54 = vsub.f32 1.0, %v2932_v55 }
0x1071   :  { %v2938_v59 = vadd.f32 %v2937_v14, %v4966_v50 }
0x1073   :  { %4462 = vtanh.f32 %v2938_v59 }
0x107d   :  { %v4463_v62 = vpop.eup %4462 }
0x107e   :  { %v2941_v63 = vmul.f32 %v4463_v62, %v2940_v54 }
0x1080   :  { %v2945_v1 = vadd.f32 %v2944_v58, %v2941_v63 }
0x1082   :  { %v2947_v20 = vrot.slane %v2945_v1, 4  ;;  %v3471_v2 = vsel %vm1893_vm9, %v3470_v40, %v2945_v1  ;;  %v3116_v32 = vrot.slane %v2945_v1, 7 }
0x1084   :  { %3752 = vmatmul.mubr.msk.f32.vlgmr.msra.gmra.mrb[32].mxu0 %vm191_vm2, %v2947_v20  ;;  %4048 = vmatmul.mubr.msk.f32.vlgmr.msra.gmra.mrb[32].mxu1 %vm191_vm2, %v2947_v20 }
0x1085   :  { %4324 = vmatpush1.bf16.msra.mxu0 %v4910_v9  ;;  %4331 = vmatpush3.bf16.msra.mxu1 %v4914_v15 }
0x1086   :  { %4326 = vmatprep.subr.bf16.mxu0 %v4912_v11  ;;  %4332 = vmatprep.subr.bf16.mxu1 %v4620_v49 }
0x1087   :  { %3188 = vmatprep.mubr.f32.mxu0 %v4618_v0  ;;  %4058 = vmatprep.mubr.msk.f32.mxu1 %vm4621_vm3, %v4618_v0 }
0x1089   :  { %4328 = vmatpush1.bf16.msra.mxu0 %v4921_v18  ;;  %4334 = vmatpush3.bf16.msra.mxu1 %v4926_v21 }
0x108a   :  { %4336 = vmatprep.subr.bf16.mxu0 %v4902_v35  ;;  %4343 = vmatprep.subr.bf16.mxu1 %v4620_v49 }
0x1157   :  { %v3016_v3 = vpop.f32.mrb[32].mxu0  ;;  %v3087_v6 = vpop.f32.mrb[32].mxu1 }
0x1158   :  { %v3093_v5 = vrot.slane %v3016_v3, 3  ;;  %v3018_v12 = vpop.f32.mrb[33].mxu0  ;;  %v4049_v26 = vpop.f32.mrb[33].mxu1  ;;  %v3107_v23 = vadd.f32 %v3087_v6, %v4961_v61  ;;  %v3475_v3 = vld [vmem:[#allocation8 + $0x20] sm:$0xff]  ;;  %v3476_v6 = vld [vmem:[#allocation8 + $0x28] sm:$0xff] }
0x1159   :  { %v3094_v16 = vrot.slane %v3018_v12, 3  ;;  %v3477_v12 = vld [vmem:[#allocation8 + $0x30] sm:$0xff]  ;;  %v3478_v26 = vld [vmem:[#allocation8 + $0x38] sm:$0xff] }
0x115a   :  { %v3097_v17 = vadd.f32 %v3093_v5, %v4955_v29  ;;  %v3109_v30 = vrot.slane %v3107_v23, 3  ;;  %v4350_v5 = vpack.c.bf16 %v3476_v6, %v3475_v3 }
0x115b   :  { %v3098_v8 = vadd.f32 %v3094_v16, %v4958_v36  ;;  %v4353_v16 = vpack.c.bf16 %v3478_v26, %v3477_v12 }
0x115c   :  { %v3099_v10 = vmul.f32 0.5, %v3097_v17 }
0x115d   :  { %v3100_v22 = vmul.f32 0.5, %v3098_v8 }
0x115e   :  { %4464 = vtanh.f32 %v3099_v10 }
0x115f   :  { %4466 = vtanh.f32 %v3100_v22 }
0x1168   :  { %v4465_v24 = vpop.eup %4464 }
0x1169   :  { %v4467_v35 = vpop.eup %4466  ;;  %v3103_v25 = vadd.f32 1.0, %v4465_v24 }
0x116a   :  { %v3104_v27 = vadd.f32 1.0, %v4467_v35 }
0x116b   :  { %v3105_v28 = vmul.f32 0.5, %v3103_v25 }
0x116c   :  { %v3106_v31 = vmul.f32 0.5, %v3104_v27 }
0x116d   :  { %v3111_v33 = vmul.f32 %v3109_v30, %v3105_v28 }
0x116e   :  { %v3118_v38 = vmul.f32 %v3116_v32, %v3106_v31  ;;  %v3114_v40 = vsub.f32 1.0, %v3106_v31 }
0x116f   :  { %v3112_v39 = vadd.f32 %v3111_v33, %v4966_v50 }
0x1171   :  { %4468 = vtanh.f32 %v3112_v39 }
0x117b   :  { %v4469_v41 = vpop.eup %4468 }
0x117c   :  { %v3115_v47 = vmul.f32 %v4469_v41, %v3114_v40 }
0x117e   :  { %v3119_v4 = vadd.f32 %v3118_v38, %v3115_v47 }
0x1180   :  { %v3121_v42 = vrot.slane %v3119_v4, 5  ;;  %v3472_v53 = vsel %vm1895_vm10, %v3471_v2, %v3119_v4  ;;  %v3290_v7 = vrot.slane %v3119_v4, 7 }
0x1182   :  { %3754 = vmatmul.mubr.msk.f32.vlgmr.msra.gmra.mrb[34].mxu0 %vm191_vm2, %v3121_v42  ;;  %4059 = vmatmul.mubr.msk.f32.vlgmr.msra.gmra.mrb[34].mxu1 %vm191_vm2, %v3121_v42 }
0x1183   :  { %4338 = vmatpush1.bf16.msra.mxu0 %v4910_v9  ;;  %4345 = vmatpush3.bf16.msra.mxu1 %v4914_v15 }
0x1184   :  { %4340 = vmatprep.subr.bf16.mxu0 %v4912_v11  ;;  %4346 = vmatprep.subr.bf16.mxu1 %v4620_v49 }
0x1185   :  { %3362 = vmatprep.mubr.f32.mxu0 %v4618_v0  ;;  %4069 = vmatprep.mubr.msk.f32.mxu1 %vm4621_vm3, %v4618_v0 }
0x1187   :  { %4342 = vmatpush1.bf16.msra.mxu0 %v4921_v18  ;;  %4348 = vmatpush3.bf16.msra.mxu1 %v4926_v21 }
0x1188   :  { %4349 = vmatprep.subr.bf16.mxu0 %v4620_v49  ;;  %4355 = vmatprep.subr.bf16.mxu1 %v4620_v49 }
0x1255   :  { %v3190_v9 = vpop.f32.mrb[34].mxu0  ;;  %v3261_v43 = vpop.f32.mrb[34].mxu1 }
0x1256   :  { %v3267_v15 = vrot.slane %v3190_v9, 2  ;;  %v3192_v44 = vpop.f32.mrb[35].mxu0  ;;  %v4060_v11 = vpop.f32.mrb[35].mxu1  ;;  %v3281_v18 = vadd.f32 %v3261_v43, %v4961_v61 }
0x1257   :  { %v3268_v45 = vrot.slane %v3192_v44, 2 }
0x1258   :  { %v3271_v46 = vadd.f32 %v3267_v15, %v4955_v29  ;;  %v3283_v19 = vrot.slane %v3281_v18, 2  ;;  %v3759_v15 = vld [vmem:[#allocation8 + $0x64] ss:$0 sm:$0xff] }
0x1259   :  { %v3272_v56 = vadd.f32 %v3268_v45, %v4958_v36 }
0x125a   :  { %v3273_v48 = vmul.f32 0.5, %v3271_v46 }
0x125b   :  { %v3274_v57 = vmul.f32 0.5, %v3272_v56 }
0x125c   :  { %4470 = vtanh.f32 %v3273_v48 }
0x125d   :  { %4472 = vtanh.f32 %v3274_v57 }
0x1266   :  { %v4471_v21 = vpop.eup %4470 }
0x1267   :  { %v4473_v51 = vpop.eup %4472  ;;  %v3277_v37 = vadd.f32 1.0, %v4471_v21 }
0x1268   :  { %v3278_v52 = vadd.f32 1.0, %v4473_v51 }
0x1269   :  { %v3279_v60 = vmul.f32 0.5, %v3277_v37 }
0x126a   :  { %v3280_v55 = vmul.f32 0.5, %v3278_v52 }
0x126b   :  { %v3285_v14 = vmul.f32 %v3283_v19, %v3279_v60 }
0x126c   :  { %v3292_v58 = vmul.f32 %v3290_v7, %v3280_v55  ;;  %v3288_v54 = vsub.f32 1.0, %v3280_v55 }
0x126d   :  { %v3286_v59 = vadd.f32 %v3285_v14, %v4966_v50 }
0x126f   :  { %4474 = vtanh.f32 %v3286_v59 }
0x1279   :  { %v4475_v62 = vpop.eup %4474 }
0x127a   :  { %v3289_v63 = vmul.f32 %v4475_v62, %v3288_v54 }
0x127c   :  { %v3293_v1 = vadd.f32 %v3292_v58, %v3289_v63 }
0x127e   :  { %v3295_v20 = vrot.slane %v3293_v1, 6  ;;  %v3473_v2 = vsel %vm1897_vm11, %v3472_v53, %v3293_v1  ;;  %v3464_v41 = vrot.slane %v3293_v1, 7 }
0x1280   :  { %3756 = vmatmul.mubr.msk.f32.vlgmr.msra.gmra.mrb[36].mxu0 %vm191_vm2, %v3295_v20  ;;  %4070 = vmatmul.mubr.msk.f32.vlgmr.msra.gmra.mrb[36].mxu1 %vm191_vm2, %v3295_v20 }
0x1281   :  { %4080 = vmatprep.mubr.msk.f32.mxu0 %vm4621_vm3, %v4618_v0  ;;  %4091 = vmatprep.mubr.msk.f32.mxu1 %vm4621_vm3, %v4618_v0 }
0x1282   :  { %4351 = vmatpush3.bf16.msra.mxu0 %v4350_v5 }
0x1283   :  { %4352 = vmatprep.subr.bf16.mxu0 %v4620_v49 }
0x1286   :  { %4354 = vmatpush3.bf16.msra.mxu0 %v4353_v16 }
0x1353   :  { %v3364_v17 = vpop.f32.mrb[36].mxu0  ;;  %v3435_v8 = vpop.f32.mrb[36].mxu1 }
0x1354   :  { %v3441_v10 = vrot.slane %v3364_v17, 1  ;;  %v3366_v22 = vpop.f32.mrb[37].mxu0  ;;  %v4071_v23 = vpop.f32.mrb[37].mxu1  ;;  %v3455_v28 = vadd.f32 %v3435_v8, %v4961_v61  ;;  %v3611_v8 = vld [vmem:[#allocation8 + $0x40] sm:$0xff] }
0x1355   :  { %v3442_v24 = vrot.slane %v3366_v22, 1  ;;  %v3614_v23 = vld [vmem:[#allocation8 + $0x58] sm:$0xff] }
0x1356   :  { %v3445_v35 = vadd.f32 %v3441_v10, %v4955_v29  ;;  %v3457_v39 = vrot.slane %v3455_v28, 1  ;;  %v3612_v10 = vld [vmem:[#allocation8 + $0x48] sm:$0xff]  ;;  %v3760_v28 = vld [vmem:[#allocation8 + $0x65] ss:$0 sm:$0xff] }
0x1357   :  { %v3446_v0 = vadd.f32 %v3442_v24, %v4958_v36  ;;  %v4356_v22 = vpack.c.bf16 %v3612_v10, %v3611_v8 }
0x1358   :  { %v3447_v25 = vmul.f32 0.5, %v3445_v35 }
0x1359   :  { %v3448_v27 = vmul.f32 0.5, %v3446_v0  ;;  %4357 = vmatpush3.bf16.msra.mxu1 %v4356_v22 }
0x135a   :  { %4476 = vtanh.f32 %v3447_v25  ;;  %4358 = vmatprep.subr.bf16.mxu1 %v4620_v49 }
0x135b   :  { %4478 = vtanh.f32 %v3448_v27 }
0x1364   :  { %v4477_v30 = vpop.eup %4476 }
0x1365   :  { %v4479_v31 = vpop.eup %4478  ;;  %v3451_v32 = vadd.f32 1.0, %v4477_v30 }
0x1366   :  { %v3452_v33 = vadd.f32 1.0, %v4479_v31  ;;  %v3761_v31 = vld [vmem:[#allocation8 + $0x66] ss:$0 sm:$0xff] }
0x1367   :  { %v3453_v38 = vmul.f32 0.5, %v3451_v32 }
0x1368   :  { %v3454_v40 = vmul.f32 0.5, %v3452_v33 }
0x1369   :  { %v3459_v47 = vmul.f32 %v3457_v39, %v3453_v38  ;;  %v3762_v38 = vld [vmem:[#allocation8 + $0x67] ss:$0 sm:$0xff] }
0x136a   :  { %v3466_v4 = vmul.f32 %v3464_v41, %v3454_v40  ;;  %v3462_v36 = vsub.f32 1.0, %v3454_v40 }
0x136b   :  { %v3460_v29 = vadd.f32 %v3459_v47, %v4966_v50 }
0x136d   :  { %4480 = vtanh.f32 %v3460_v29 }
0x1377   :  { %v4481_v42 = vpop.eup %4480 }
0x1378   :  { %v3463_v53 = vmul.f32 %v4481_v42, %v3462_v36 }
0x137a   :  { %v3467_v9 = vadd.f32 %v3466_v4, %v3463_v53 }
0x137c   :  { %v3474_v43 = vsel %vm1899_vm12, %v3473_v2, %v3467_v9 }
0x137d   :  { %4081 = vmatmul.mubr.msk.f32.vlgmr.msra.gmra.mrb[38].mxu0 %vm191_vm2, %v3474_v43 }
0x1450   :  { %v3548_v61 = vpop.f32.mrb[38].mxu0 }
0x1451   :  { %v3552_v44 = vadd.f32 %v3548_v61, %v4703_v13  ;;  %v4082_v11 = vpop.f32.mrb[39].mxu0 }
0x1453   :  { %v3558_v45 = vadd.f32 %v3759_v15, %v3552_v44 }
0x1455   :  { %v3560_v46 = vmul.f32 0.70710677, %v3558_v45  ;;  %v3559_v20 = vmul.f32 0.5, %v3558_v45 }
0x1457   :  { %v3563_v56 = vand.u32 2147483647, %v3560_v46  ;;  %vm3561_vm13 = vcmp.lt.f32.partialorder %v3560_v46, 0.0 }
0x1458   :  { %v3562_v63 = vsel %vm3561_vm13, -1.0, %v4619_v34  ;;  %v3613_v34 = vld [vmem:[#allocation8 + $0x50] sm:$0xff] }
0x1459   :  { %v3564_v48 = vmul.f32 0.3275911, %v3563_v56  ;;  %v3577_v50 = vsub.f32 0.0, %v3563_v56  ;;  %v4359_v24 = vpack.c.bf16 %v3614_v23, %v3613_v34 }
0x145b   :  { %v3565_v57 = vadd.f32 1.0, %v3564_v48  ;;  %v3578_v21 = vmul.f32 %v3577_v50, %v3563_v56  ;;  %4360 = vmatpush3.bf16.msra.mxu1 %v4359_v24 }
0x145d   :  { %4482 = vrcp.f32 %v3565_v57  ;;  %v3579_v52 = vmul.f32 1.442695, %v3578_v21 }
0x145f   :  { %4484 = vpow2.f32 %v3579_v52 }
0x1467   :  { %v4483_v18 = vpop.eup %4482 }
0x1468   :  { %v3568_v51 = vmul.f32 1.0614054, %v4483_v18 }
0x1469   :  { %v4485_v59 = vpop.eup %4484 }
0x146a   :  { %v3569_v37 = vadd.f32 -1.4531521, %v3568_v51 }
0x146c   :  { %v3570_v60 = vmul.f32 %v4483_v18, %v3569_v37 }
0x146e   :  { %v3571_v19 = vadd.f32 1.4214138, %v3570_v60 }
0x1470   :  { %v3572_v55 = vmul.f32 %v4483_v18, %v3571_v19 }
0x1472   :  { %v3573_v7 = vadd.f32 -0.28449672, %v3572_v55 }
0x1474   :  { %v3574_v14 = vmul.f32 %v4483_v18, %v3573_v7 }
0x1476   :  { %v3575_v13 = vadd.f32 0.2548296, %v3574_v14 }
0x1478   :  { %v3576_v58 = vmul.f32 %v4483_v18, %v3575_v13 }
0x147a   :  { %v3581_v54 = vmul.f32 %v4485_v59, %v3576_v58 }
0x147c   :  { %v3582_v62 = vsub.f32 1.0, %v3581_v54 }
0x147e   :  { %v3583_v1 = vmul.f32 %v3582_v62, %v3562_v63 }
0x1480   :  { %v3584_v2 = vadd.f32 1.0, %v3583_v1 }
0x1482   :  { %v3585_v3 = vmul.f32 %v3584_v2, %v3559_v20 }
0x1484   :  { %v3588_v6 = vsel %vm191_vm2, %v3585_v3, 0.0 }
0x1485   :  { %3589 = vadd.xlane.f32.xlu1 %v3588_v6 }
0x1512   :  { %v3590_v5 = vpop.xlane.xlu1 %3589 }
0x1513   :  { %v3591_v12 = vmul.f32 0.03125, %v3590_v5 }
0x1515   :  { %v3592_v26 = vsub.f32 %v3585_v3, %v3591_v12 }
0x1517   :  { %v3593_v16 = vmul.f32 %v3592_v26, %v3592_v26 }
0x1519   :  { %v3594_v17 = vsel %vm191_vm2, %v3593_v16, 0.0 }
0x151a   :  { %3595 = vadd.xlane.f32.xlu1 %v3594_v17 }
0x15a7   :  { %v3596_v35 = vpop.xlane.xlu1 %3595 }
0x15a8   :  { %v3597_v0 = vmul.f32 0.03125, %v3596_v35 }
0x15aa   :  { %v3598_v25 = vadd.f32 1e-05, %v3597_v0 }
0x15ac   :  { %4486 = vrsqrt.f32 %v3598_v25 }
0x15b6   :  { %v4487_v27 = vpop.eup %4486 }
0x15b7   :  { %v3600_v30 = vmul.f32 %v4487_v27, %v3592_v26 }
0x15b9   :  { %v3605_v32 = vmul.f32 %v3760_v28, %v3600_v30 }
0x15bb   :  { %v3610_v33 = vadd.f32 %v3761_v31, %v3605_v32 }
0x15bd   :  { %4092 = vmatmul.mubr.msk.f32.vlgmr.msra.gmra.mrb[38].mxu1 %vm191_vm2, %v3610_v33 }
0x1690   :  { %v3689_v39 = vpop.f32.mrb[38].mxu1 }
0x1691   :  { %v3690_v40 = vadd.f32 %v3762_v38, %v3689_v39  ;;  %v4093_v49 = vpop.f32.mrb[39].mxu1 }
0x1693   :  { %v3693_v41 = vmul.f32 0.5, %v3690_v40 }
0x1695   :  { %4488 = vtanh.f32 %v3693_v41 }
0x169f   :  { %v4489_v47 = vpop.eup %4488 }
0x16a0   :  { %v3695_v4 = vadd.f32 1.0, %v4489_v47 }
0x16a2   :  { %v3696_v29 = vmul.f32 0.5, %v3695_v4 }
0x16a4   :  { %3698 = vst.msk [vmem:[#allocation10] sm:$0xff] %vm3697_vm14, %v3696_v29 }
0x16a5   :  { %4589 = shalt.err (!%p4586_p8)
}
0x16a6   :  { %s4590_s25 = scalar_lea.hbm %s5119_s5, 128 }
0x16a7   :  { %p4591_p9 = scmp.ne.s32.totalorder %s5119_s5, %s4590_s25  ;;  %p4594_p10 = scmp.lt.u32.totalorder %s4590_s25, %s5119_s5 }
0x16a9   :  { %p4596_p11 = pnand %p4594_p10, %p4591_p9 }
0x16ab   :  { %4599 = shalt.err (!%p4596_p11)
}
0x16ac   :  { %3708 = dma.vmem_to_hbm [thread:$0]  %s3706_s21, 128, %s5119_s5, [#allocation4]  }
0x16ad   :  { %4606 = dma.done.wait [#allocation4], 128  }
0x16ae   :  { %4607 = vsyncadd [#allocation4], 4294967168 }
0x16af   :  { %3712 = vsyncpa [#allocation3], 1 }
0x16b0   :  { %3713 = vsyncpa [#allocation6], 1 }
0x16b1   :  { %3714 = vsyncpa [#allocation9], 1 }
0x16b2   :  { %3715 = vsyncpa [#allocation4], 1 }

</bundles_post_ra>
